<compile_context>
chip_gen: v5e
topology: v5e:2x2
jax: 0.10.0
libtpu: 0.0.40
codegen_flags: <defaults>
</compile_context>

<pallas_src>
from functools import partial

import jax
import jax.numpy as jnp
from jax.experimental import pallas as pl
from jax.experimental.pallas import tpu as pltpu

LN_EPS = 1e-12  # HF BERT LayerNorm eps


def _layernorm(x, g, b):
    # single-pass formulation: var = E[x^2] - mu^2
    mu = jnp.mean(x, axis=-1, keepdims=True)
    var = jnp.mean(x * x, axis=-1, keepdims=True) - mu * mu
    return (x - mu) * jax.lax.rsqrt(var + LN_EPS) * g + b


# -------------------------- fused encoder + classifier kernel --------------------------

def encoder_classifier_kernel(emb_ref, embg_ref, embb_ref,
                              wq_ref, wk_ref, wv_ref, wo_ref,
                              wi_ref, w2_ref, vec_ref, bi_ref,
                              clsw_ref, clsb_ref,
                              h_out, amax_out,
                              *, num_heads, head_dim, num_labels):
    layer = pl.program_id(0)

    # Fused embedding LayerNorm: initialize the carried hidden state (which
    # lives in the output ref -- same block for every layer, so it is VMEM
    # resident across the whole grid).
    @pl.when(layer == 0)
    def _():
        h_out[...] = _layernorm(emb_ref[...], embg_ref[...], embb_ref[...])

    h = h_out[...]                                   # (S, H) f32 carried state
    S, H = h.shape
    hb = h.astype(jnp.bfloat16)

    # packed per-layer bias / LN slab: rows = bq bk bv bo ln1g ln1b b2 ln2g ln2b
    vec = vec_ref[...]                               # (9, H) f32
    bq, bk, bv, bo = vec[0:1], vec[1:2], vec[2:3], vec[3:4]
    ln1g, ln1b = vec[4:5], vec[5:6]
    b2, ln2g, ln2b = vec[6:7], vec[7:8], vec[8:9]

    # Q/K weights & biases were pre-scaled by head_dim**-0.25 at init (as in
    # the reference __init__), so no explicit 1/sqrt(d) appears here.
    q = jnp.dot(hb, wq_ref[...], preferred_element_type=jnp.float32) + bq
    k = jnp.dot(hb, wk_ref[...], preferred_element_type=jnp.float32) + bk
    v = jnp.dot(hb, wv_ref[...], preferred_element_type=jnp.float32) + bv

    def split_heads(x):                              # cast to bf16 BEFORE the relayout
        return jnp.swapaxes(x.astype(jnp.bfloat16).reshape(S, num_heads, head_dim), 0, 1)

    qh, kh, vh = split_heads(q), split_heads(k), split_heads(v)   # (nh, S, dh) bf16

    # batched-head attention (head is the batch dim of the matmuls)
    s = jnp.einsum('hqd,hkd->hqk', qh, kh,
                   preferred_element_type=jnp.float32)            # (nh, S, S) f32
    s = s - jnp.max(s, axis=-1, keepdims=True)
    p = jnp.exp(s)
    p = p * pl.reciprocal(jnp.sum(p, axis=-1, keepdims=True), approx=True)
    ctx = jnp.einsum('hqk,hkd->hqd', p.astype(jnp.bfloat16), vh,
                     preferred_element_type=jnp.float32)          # (nh, S, dh) f32
    # cast before the swap-back so the relayout moves bf16, not f32
    ctx = jnp.swapaxes(ctx.astype(jnp.bfloat16), 0, 1).reshape(S, H)

    # single fused output projection over the concatenated heads
    attn = jnp.dot(ctx, wo_ref[...], preferred_element_type=jnp.float32) + bo
    x1 = _layernorm(attn + h, ln1g, ln1b)

    inter = jnp.dot(x1.astype(jnp.bfloat16), wi_ref[...],
                    preferred_element_type=jnp.float32) + bi_ref[...]
    # TODO(synk): HF BERT default intermediate_act_fn is exact erf-GELU; using tanh approx.
    inter = jax.nn.gelu(inter, approximate=True)
    ffn = jnp.dot(inter.astype(jnp.bfloat16), w2_ref[...],
                  preferred_element_type=jnp.float32) + b2
    new_h = _layernorm(ffn + x1, ln2g, ln2b)

    h_out[...] = new_h                               # carry for the next layer

    # Fused classifier + argmax on the last layer (second output).
    @pl.when(layer == pl.num_programs(0) - 1)
    def _():
        logits = jnp.dot(new_h.astype(jnp.bfloat16), clsw_ref[...],
                         preferred_element_type=jnp.float32) + clsb_ref[...]   # (S, L)
        m = jnp.max(logits, axis=-1, keepdims=True)
        lane_idx = jax.lax.broadcasted_iota(jnp.int32, logits.shape, 1)
        cand = jnp.where(logits == m, lane_idx, num_labels)
        amax_out[...] = jnp.min(cand, axis=-1, keepdims=True)                  # (S,1) i32


# -------------------------- pallas_call wrapper --------------------------

def encoder_classifier(emb, emb_ln_g, emb_ln_b, layers, cls_w, cls_b, *,
                       num_heads, head_dim, num_labels):
    """Embedding-LN + all encoder layers + classifier argmax in ONE pallas_call."""
    L = layers["wq"].shape[0]
    S, H = emb.shape
    I = layers["wi"].shape[2]
    NL = cls_w.shape[1]

    def wspec(shape):
        # stacked weight (L, *shape): squeeze the layer axis, index by program_id
        n = len(shape)
        return pl.BlockSpec((None,) + shape, lambda l, _n=n: (l,) + (0,) * _n)

    def full(shape):
        n = len(shape)
        return pl.BlockSpec(shape, lambda l, _n=n: (0,) * _n)

    in_specs = [
        full((S, H)), full((1, H)), full((1, H)),                    # emb, emb LN g/b
        wspec((H, H)), wspec((H, H)), wspec((H, H)), wspec((H, H)),  # wq wk wv wo
        wspec((H, I)), wspec((I, H)),                                # wi, w2
        wspec((9, H)), wspec((1, I)),                                # bias/LN slab, bi
        full((H, NL)), full((1, NL)),                                # cls w, b
    ]

    # VMEM limit: per-layer weights (double-buffered + working copy) plus a
    # realistic activation footprint (q/k/v, scores+probs, ctx, FFN interm.).
    stacked = (layers["wq"], layers["wk"], layers["wv"], layers["wo"],
               layers["wi"], layers["w2"], layers["vec"], layers["bi"])
    per_layer_w = sum((a.size // L) * a.dtype.itemsize for a in stacked)
    act_bytes = (5 * S * H * 4                       # hidden, residual, q, k, v (f32)
                 + num_heads * S * S * 6             # scores f32 + probs bf16
                 + S * H * 6                         # context f32 + bf16
                 + S * I * 6                         # FFN intermediate f32 + bf16
                 + S * NL * 4)                       # logits
    try:
        phys_vmem = pltpu.get_tpu_info().vmem_capacity_bytes
    except Exception:  # pragma: no cover - conservative fallback
        phys_vmem = 64 << 20
    vmem_limit = int(min((3 * phys_vmem) // 4,
                         max(16 << 20, 3 * per_layer_w + act_bytes + (4 << 20))))

    # advisory cost estimate (matmul flops + exp/gelu transcendentals + weight bytes)
    flops = L * (2 * S * H * H * 4 + 2 * S * H * I * 2 + 4 * S * S * H) + 2 * S * H * NL
    transc = L * (num_heads * S * S + S * I)
    bytes_acc = (sum(a.size * a.dtype.itemsize for a in stacked)
                 + emb.size * emb.dtype.itemsize
                 + cls_w.size * cls_w.dtype.itemsize
                 + S * H * 4 + S * 4)
    cost = pl.CostEstimate(flops=int(flops), transcendentals=int(transc),
                           bytes_accessed=int(bytes_acc))

    grid_spec = pltpu.PrefetchScalarGridSpec(
        num_scalar_prefetch=0,
        grid=(L,),
        in_specs=in_specs,
        out_specs=[pl.BlockSpec((S, H), lambda l: (0, 0)),   # carried hidden state
                   pl.BlockSpec((S, 1), lambda l: (0, 0))],  # argmax ids
    )

    return pl.pallas_call(
        partial(encoder_classifier_kernel, num_heads=num_heads,
                head_dim=head_dim, num_labels=num_labels),
        out_shape=(jax.ShapeDtypeStruct((S, H), jnp.float32),
                   jax.ShapeDtypeStruct((S, 1), jnp.int32)),
        grid_spec=grid_spec,
        compiler_params=pltpu.CompilerParams(
            dimension_semantics=("arbitrary",),
            vmem_limit_bytes=vmem_limit),
        cost_estimate=cost,
    )(emb, emb_ln_g, emb_ln_b,
      layers["wq"], layers["wk"], layers["wv"], layers["wo"],
      layers["wi"], layers["w2"], layers["vec"], layers["bi"],
      cls_w, cls_b)


# -------------------------- parameters (deterministic, synthetic) --------------------------

def init_params(key, *, vocab_size, hidden, num_heads, num_layers,
                intermediate, num_labels, max_seq_len, max_pos, type_vocab=2):
    head_dim = hidden // num_heads
    factor = float(head_dim) ** (-0.25)          # attention_head_size_factor from __init__
    keys = iter(jax.random.split(key, 8 + 16 * num_layers))

    def nrm(shape, scale=0.02):
        return scale * jax.random.normal(next(keys), shape, dtype=jnp.float32)

    def bf(x):
        return x.astype(jnp.bfloat16)

    params = {
        "word_emb": nrm((vocab_size, hidden)),
        # reference __init__ quirk: token_type weight[[0], :max_seq_len].unsqueeze(-1)
        # -> (1, max_seq_len, 1); requires max_seq_len <= hidden (true here, 16 <= 32).
        "tok_emb": nrm((type_vocab, hidden))[jnp.array([0]), :max_seq_len][..., None],
        # reference __init__: position weight[:max_seq_len].unsqueeze(0) -> (1, L, H)
        "pos_emb": nrm((max_pos, hidden))[:max_seq_len][None],
        "emb_ln_g": 1.0 + nrm((1, hidden)),
        "emb_ln_b": nrm((1, hidden)),
        # classifier weight pre-transposed to (in, out), bf16
        "cls_w": bf(nrm((num_labels, hidden)).T),
        "cls_b": nrm((1, num_labels)),
    }

    layer_list = []
    for _ in range(num_layers):
        wq = bf(nrm((hidden, hidden)).T * factor)
        bq = nrm((1, hidden)) * factor
        wk = bf(nrm((hidden, hidden)).T * factor)
        bk = nrm((1, hidden)) * factor
        wv = bf(nrm((hidden, hidden)).T)
        bv = nrm((1, hidden))
        wo = bf(nrm((hidden, hidden)).T)
        bo = nrm((1, hidden))
        ln1_g = 1.0 + nrm((1, hidden))
        ln1_b = nrm((1, hidden))
        wi = bf(nrm((intermediate, hidden)).T)       # (H, I)
        bi = nrm((1, intermediate))
        w2 = bf(nrm((hidden, intermediate)).T)       # (I, H)
        b2 = nrm((1, hidden))
        ln2_g = 1.0 + nrm((1, hidden))
        ln2_b = nrm((1, hidden))
        # pack the eight (1,H) vectors + b2 into one slab: one DMA per layer step
        vec = jnp.concatenate([bq, bk, bv, bo, ln1_g, ln1_b, b2, ln2_g, ln2_b], axis=0)
        layer_list.append({"wq": wq, "wk": wk, "wv": wv, "wo": wo,
                           "wi": wi, "w2": w2, "vec": vec, "bi": bi})

    # stack along a leading layer axis so one pallas_call can index by program_id
    params["layers"] = {k: jnp.stack([lyr[k] for lyr in layer_list])
                        for k in layer_list[0]}
    return params


# -------------------------- forward --------------------------

def bert_forward(params, input_ids, punc_ids, ids_len, *,
                 num_heads, head_dim, num_labels):
    # DYNAMIC_AXES == False path: static slice to ids_len
    input_ids = input_ids[:, :ids_len]
    punc_ids = punc_ids[:, :ids_len]
    S = ids_len

    # embedding gather is plain-JAX glue (dynamic int gather)
    word = jnp.take(params["word_emb"], input_ids[0], axis=0)          # (S, H)
    tok = params["tok_emb"][0, :ids_len, :]                            # (S, 1) broadcast
    pos = params["pos_emb"][0, :ids_len, :]                            # (S, H)
    emb = word + tok + pos                                             # (S, H) f32

    _, amax = encoder_classifier(
        emb, params["emb_ln_g"], params["emb_ln_b"], params["layers"],
        params["cls_w"], params["cls_b"],
        num_heads=num_heads, head_dim=head_dim, num_labels=num_labels)

    max_logit_ids = amax[:, 0][None, :].astype(jnp.int32) * punc_ids   # (1, S)
    # TODO(synk): torch.nonzero has a dynamic output shape; computed eagerly in plain JAX.
    turn_indices = jnp.nonzero(max_logit_ids)[-1].astype(jnp.int32)
    return turn_indices, turn_indices.shape[-1]


# -------------------------- main --------------------------

if __name__ == "__main__":
    VOCAB, HIDDEN, HEADS, LAYERS, INTER, LABELS = 64, 32, 2, 2, 64, 4
    MAX_SEQ_LEN, MAX_POS, IDS_LEN = 16, 32, 8

    key = jax.random.PRNGKey(0)
    pkey, ikey, qkey = jax.random.split(key, 3)

    params = init_params(pkey, vocab_size=VOCAB, hidden=HIDDEN, num_heads=HEADS,
                         num_layers=LAYERS, intermediate=INTER, num_labels=LABELS,
                         max_seq_len=MAX_SEQ_LEN, max_pos=MAX_POS)

    input_ids = jax.random.randint(ikey, (1, MAX_SEQ_LEN), 0, VOCAB, dtype=jnp.int32)
    punc_ids = jax.random.randint(qkey, (1, MAX_SEQ_LEN), 0, 2, dtype=jnp.int32)

    turn_indices, n_turns = bert_forward(
        params, input_ids, punc_ids, IDS_LEN,
        num_heads=HEADS, head_dim=HIDDEN // HEADS, num_labels=LABELS)

    jax.block_until_ready(turn_indices)
    print("KERNEL_OK")
</pallas_src>

<mosaic_0001>
module attributes {stable_mosaic.version = 11 : i64} {
  func.func @encoder_classifier_kernel(%arg0: i32, %arg1: memref<8x32xf32, #tpu.memory_space<vmem>>, %arg2: memref<1x32xf32, #tpu.memory_space<vmem>>, %arg3: memref<1x32xf32, #tpu.memory_space<vmem>>, %arg4: memref<1x32x32xbf16, #tpu.memory_space<vmem>>, %arg5: memref<1x32x32xbf16, #tpu.memory_space<vmem>>, %arg6: memref<1x32x32xbf16, #tpu.memory_space<vmem>>, %arg7: memref<1x32x32xbf16, #tpu.memory_space<vmem>>, %arg8: memref<1x32x64xbf16, #tpu.memory_space<vmem>>, %arg9: memref<1x64x32xbf16, #tpu.memory_space<vmem>>, %arg10: memref<1x9x32xf32, #tpu.memory_space<vmem>>, %arg11: memref<1x1x64xf32, #tpu.memory_space<vmem>>, %arg12: memref<32x4xbf16, #tpu.memory_space<vmem>>, %arg13: memref<1x4xf32, #tpu.memory_space<vmem>>, %arg14: memref<8x32xf32, #tpu.memory_space<vmem>>, %arg15: memref<8x1xi32, #tpu.memory_space<vmem>>) attributes {dimension_semantics = [#tpu.dimension_semantics<arbitrary>], iteration_bounds = array<i64: 2>, scalar_prefetch = 0 : i64, scratch_operands = 0 : i64, tpu.core_type = #tpu.core_type<tc>, window_params = [{pipeline_mode = #tpu.pipeline_mode<synchronous>, transform_indices = @transform_0, window_bounds = array<i64: 8, 32>}, {pipeline_mode = #tpu.pipeline_mode<synchronous>, transform_indices = @transform_1, window_bounds = array<i64: 1, 32>}, {pipeline_mode = #tpu.pipeline_mode<synchronous>, transform_indices = @transform_2, window_bounds = array<i64: 1, 32>}, {transform_indices = @transform_3, window_bounds = array<i64: 1, 32, 32>}, {transform_indices = @transform_4, window_bounds = array<i64: 1, 32, 32>}, {transform_indices = @transform_5, window_bounds = array<i64: 1, 32, 32>}, {transform_indices = @transform_6, window_bounds = array<i64: 1, 32, 32>}, {transform_indices = @transform_7, window_bounds = array<i64: 1, 32, 64>}, {transform_indices = @transform_8, window_bounds = array<i64: 1, 64, 32>}, {transform_indices = @transform_9, window_bounds = array<i64: 1, 9, 32>}, {transform_indices = @transform_10, window_bounds = array<i64: 1, 1, 64>}, {pipeline_mode = #tpu.pipeline_mode<synchronous>, transform_indices = @transform_11, window_bounds = array<i64: 32, 4>}, {pipeline_mode = #tpu.pipeline_mode<synchronous>, transform_indices = @transform_12, window_bounds = array<i64: 1, 4>}, {pipeline_mode = #tpu.pipeline_mode<synchronous>, transform_indices = @transform_13, window_bounds = array<i64: 8, 32>}, {pipeline_mode = #tpu.pipeline_mode<synchronous>, transform_indices = @transform_14, window_bounds = array<i64: 8, 1>}]} {
    %c0_i32 = arith.constant 0 : i32
    %0 = arith.cmpi eq, %arg0, %c0_i32 : i32
    %1 = arith.extui %0 : i1 to i32
    %c0_i32_0 = arith.constant 0 : i32
    %2 = arith.cmpi ne, %1, %c0_i32_0 : i32
    scf.if %2 {
      %c0_52 = arith.constant 0 : index
      %c0_53 = arith.constant 0 : index
      %138 = vector.load %arg1[%c0_52, %c0_53] : memref<8x32xf32, #tpu.memory_space<vmem>>, vector<8x32xf32>
      %c0_54 = arith.constant 0 : index
      %c0_55 = arith.constant 0 : index
      %139 = vector.load %arg2[%c0_54, %c0_55] : memref<1x32xf32, #tpu.memory_space<vmem>>, vector<1x32xf32>
      %c0_56 = arith.constant 0 : index
      %c0_57 = arith.constant 0 : index
      %140 = vector.load %arg3[%c0_56, %c0_57] : memref<1x32xf32, #tpu.memory_space<vmem>>, vector<1x32xf32>
      %cst_58 = arith.constant dense<0.000000e+00> : vector<8xf32>
      %141 = vector.multi_reduction <add>, %138, %cst_58 [1] : vector<8x32xf32> to vector<8xf32>
      %142 = vector.shape_cast %141 : vector<8xf32> to vector<8x1xf32>
      %cst_59 = arith.constant 3.200000e+01 : f32
      %143 = vector.broadcast %cst_59 : f32 to vector<8x1xf32>
      %144 = arith.divf %142, %143 : vector<8x1xf32>
      %145 = arith.mulf %138, %138 : vector<8x32xf32>
      %cst_60 = arith.constant dense<0.000000e+00> : vector<8xf32>
      %146 = vector.multi_reduction <add>, %145, %cst_60 [1] : vector<8x32xf32> to vector<8xf32>
      %147 = vector.shape_cast %146 : vector<8xf32> to vector<8x1xf32>
      %cst_61 = arith.constant 3.200000e+01 : f32
      %148 = vector.broadcast %cst_61 : f32 to vector<8x1xf32>
      %149 = arith.divf %147, %148 : vector<8x1xf32>
      %150 = arith.mulf %144, %144 : vector<8x1xf32>
      %151 = arith.subf %149, %150 : vector<8x1xf32>
      %152 = vector.broadcast %144 : vector<8x1xf32> to vector<8x32xf32>
      %153 = arith.subf %138, %152 : vector<8x32xf32>
      %cst_62 = arith.constant 9.99999996E-13 : f32
      %154 = vector.broadcast %cst_62 : f32 to vector<8x1xf32>
      %155 = arith.addf %151, %154 : vector<8x1xf32>
      %156 = math.rsqrt %155 : vector<8x1xf32>
      %157 = vector.broadcast %156 : vector<8x1xf32> to vector<8x32xf32>
      %158 = arith.mulf %153, %157 : vector<8x32xf32>
      %159 = vector.broadcast %139 : vector<1x32xf32> to vector<8x32xf32>
      %160 = arith.mulf %158, %159 : vector<8x32xf32>
      %161 = vector.broadcast %140 : vector<1x32xf32> to vector<8x32xf32>
      %162 = arith.addf %160, %161 : vector<8x32xf32>
      %c0_63 = arith.constant 0 : index
      %c0_64 = arith.constant 0 : index
      %163 = vector.load %arg14[%c0_63, %c0_64] : memref<8x32xf32, #tpu.memory_space<vmem>>, vector<8x32xf32>
      tpu.vector_store %arg14[%c0_63, %c0_64], %162 {strides = array<i32>} : memref<8x32xf32, #tpu.memory_space<vmem>>, vector<8x32xf32>,
    } else {
    }
    %c0 = arith.constant 0 : index
    %c0_1 = arith.constant 0 : index
    %3 = vector.load %arg14[%c0, %c0_1] : memref<8x32xf32, #tpu.memory_space<vmem>>, vector<8x32xf32>
    %4 = arith.truncf %3 : vector<8x32xf32> to vector<8x32xbf16>
    %c0_2 = arith.constant 0 : index
    %c0_3 = arith.constant 0 : index
    %c0_4 = arith.constant 0 : index
    %5 = vector.load %arg10[%c0_2, %c0_3, %c0_4] : memref<1x9x32xf32, #tpu.memory_space<vmem>>, vector<1x9x32xf32>
    %6 = vector.shape_cast %5 : vector<1x9x32xf32> to vector<9x32xf32>
    %7 = vector.extract_strided_slice %6 {offsets = [0, 0], sizes = [1, 32], strides = [1, 1]} : vector<9x32xf32> to vector<1x32xf32>
    %8 = vector.extract_strided_slice %6 {offsets = [1, 0], sizes = [1, 32], strides = [1, 1]} : vector<9x32xf32> to vector<1x32xf32>
    %9 = vector.extract_strided_slice %6 {offsets = [2, 0], sizes = [1, 32], strides = [1, 1]} : vector<9x32xf32> to vector<1x32xf32>
    %10 = vector.extract_strided_slice %6 {offsets = [3, 0], sizes = [1, 32], strides = [1, 1]} : vector<9x32xf32> to vector<1x32xf32>
    %11 = vector.extract_strided_slice %6 {offsets = [4, 0], sizes = [1, 32], strides = [1, 1]} : vector<9x32xf32> to vector<1x32xf32>
    %12 = vector.extract_strided_slice %6 {offsets = [5, 0], sizes = [1, 32], strides = [1, 1]} : vector<9x32xf32> to vector<1x32xf32>
    %13 = vector.extract_strided_slice %6 {offsets = [6, 0], sizes = [1, 32], strides = [1, 1]} : vector<9x32xf32> to vector<1x32xf32>
    %14 = vector.extract_strided_slice %6 {offsets = [7, 0], sizes = [1, 32], strides = [1, 1]} : vector<9x32xf32> to vector<1x32xf32>
    %15 = vector.extract_strided_slice %6 {offsets = [8, 0], sizes = [1, 32], strides = [1, 1]} : vector<9x32xf32> to vector<1x32xf32>
    %c0_5 = arith.constant 0 : index
    %c0_6 = arith.constant 0 : index
    %c0_7 = arith.constant 0 : index
    %16 = vector.load %arg4[%c0_5, %c0_6, %c0_7] : memref<1x32x32xbf16, #tpu.memory_space<vmem>>, vector<1x32x32xbf16>
    %17 = vector.shape_cast %16 : vector<1x32x32xbf16> to vector<32x32xbf16>
    %cst = arith.constant dense<0.000000e+00> : vector<8x32xf32>
    %18 = tpu.matmul %4, %17, %cst {dimension_numbers = #tpu.dot_dimension_numbers<[1], [0], [0], [1], [0, 0, 1, 1], [], []>} : vector<8x32xbf16>, vector<32x32xbf16>, vector<8x32xf32> -> vector<8x32xf32>
    %19 = vector.broadcast %7 : vector<1x32xf32> to vector<8x32xf32>
    %20 = arith.addf %18, %19 : vector<8x32xf32>
    %c0_8 = arith.constant 0 : index
    %c0_9 = arith.constant 0 : index
    %c0_10 = arith.constant 0 : index
    %21 = vector.load %arg5[%c0_8, %c0_9, %c0_10] : memref<1x32x32xbf16, #tpu.memory_space<vmem>>, vector<1x32x32xbf16>
    %22 = vector.shape_cast %21 : vector<1x32x32xbf16> to vector<32x32xbf16>
    %cst_11 = arith.constant dense<0.000000e+00> : vector<8x32xf32>
    %23 = tpu.matmul %4, %22, %cst_11 {dimension_numbers = #tpu.dot_dimension_numbers<[1], [0], [0], [1], [0, 0, 1, 1], [], []>} : vector<8x32xbf16>, vector<32x32xbf16>, vector<8x32xf32> -> vector<8x32xf32>
    %24 = vector.broadcast %8 : vector<1x32xf32> to vector<8x32xf32>
    %25 = arith.addf %23, %24 : vector<8x32xf32>
    %c0_12 = arith.constant 0 : index
    %c0_13 = arith.constant 0 : index
    %c0_14 = arith.constant 0 : index
    %26 = vector.load %arg6[%c0_12, %c0_13, %c0_14] : memref<1x32x32xbf16, #tpu.memory_space<vmem>>, vector<1x32x32xbf16>
    %27 = vector.shape_cast %26 : vector<1x32x32xbf16> to vector<32x32xbf16>
    %cst_15 = arith.constant dense<0.000000e+00> : vector<8x32xf32>
    %28 = tpu.matmul %4, %27, %cst_15 {dimension_numbers = #tpu.dot_dimension_numbers<[1], [0], [0], [1], [0, 0, 1, 1], [], []>} : vector<8x32xbf16>, vector<32x32xbf16>, vector<8x32xf32> -> vector<8x32xf32>
    %29 = vector.broadcast %9 : vector<1x32xf32> to vector<8x32xf32>
    %30 = arith.addf %28, %29 : vector<8x32xf32>
    %31 = arith.truncf %20 : vector<8x32xf32> to vector<8x32xbf16>
    %32 = vector.shape_cast %31 : vector<8x32xbf16> to vector<8x2x16xbf16>
    %33 = tpu.transpose %32, [1, 0, 2] : vector<8x2x16xbf16> -> vector<2x8x16xbf16>
    %34 = arith.truncf %25 : vector<8x32xf32> to vector<8x32xbf16>
    %35 = vector.shape_cast %34 : vector<8x32xbf16> to vector<8x2x16xbf16>
    %36 = tpu.transpose %35, [1, 0, 2] : vector<8x2x16xbf16> -> vector<2x8x16xbf16>
    %37 = arith.truncf %30 : vector<8x32xf32> to vector<8x32xbf16>
    %38 = vector.shape_cast %37 : vector<8x32xbf16> to vector<8x2x16xbf16>
    %39 = tpu.transpose %38, [1, 0, 2] : vector<8x2x16xbf16> -> vector<2x8x16xbf16>
    "tpu.trace_start"() <{level = 10 : i32, message = "hqd,hkd->hqk"}> : () -> ()
    %cst_16 = arith.constant dense<0.000000e+00> : vector<2x8x8xf32>
    %40 = tpu.matmul %33, %36, %cst_16 {dimension_numbers = #tpu.dot_dimension_numbers<[2], [2], [1], [1], [0, 0, 0, 1, 1, 1], [0], [0]>} : vector<2x8x16xbf16>, vector<2x8x16xbf16>, vector<2x8x8xf32> -> vector<2x8x8xf32>
    "tpu.trace_stop"() : () -> ()
    %cst_17 = arith.constant dense<0xFF800000> : vector<2x8xf32>
    %41 = vector.multi_reduction <maximumf>, %40, %cst_17 [2] : vector<2x8x8xf32> to vector<2x8xf32>
    %42 = vector.shape_cast %41 : vector<2x8xf32> to vector<2x8x1xf32>
    %43 = vector.broadcast %42 : vector<2x8x1xf32> to vector<2x8x8xf32>
    %44 = arith.subf %40, %43 : vector<2x8x8xf32>
    %45 = math.exp %44 : vector<2x8x8xf32>
    %cst_18 = arith.constant dense<0.000000e+00> : vector<2x8xf32>
    %46 = vector.multi_reduction <add>, %45, %cst_18 [2] : vector<2x8x8xf32> to vector<2x8xf32>
    %47 = vector.shape_cast %46 : vector<2x8xf32> to vector<2x8x1xf32>
    %48 = tpu.reciprocal %47 {approx = true} : vector<2x8x1xf32> -> vector<2x8x1xf32>
    %49 = vector.broadcast %48 : vector<2x8x1xf32> to vector<2x8x8xf32>
    %50 = arith.mulf %45, %49 : vector<2x8x8xf32>
    %51 = arith.truncf %50 : vector<2x8x8xf32> to vector<2x8x8xbf16>
    "tpu.trace_start"() <{level = 10 : i32, message = "hqk,hkd->hqd"}> : () -> ()
    %cst_19 = arith.constant dense<0.000000e+00> : vector<2x8x16xf32>
    %52 = tpu.matmul %51, %39, %cst_19 {dimension_numbers = #tpu.dot_dimension_numbers<[2], [1], [1], [2], [0, 0, 0, 1, 1, 2], [0], [0]>} : vector<2x8x8xbf16>, vector<2x8x16xbf16>, vector<2x8x16xf32> -> vector<2x8x16xf32>
    "tpu.trace_stop"() : () -> ()
    %53 = arith.truncf %52 : vector<2x8x16xf32> to vector<2x8x16xbf16>
    %54 = tpu.transpose %53, [1, 0, 2] : vector<2x8x16xbf16> -> vector<8x2x16xbf16>
    %55 = vector.shape_cast %54 : vector<8x2x16xbf16> to vector<8x32xbf16>
    %c0_20 = arith.constant 0 : index
    %c0_21 = arith.constant 0 : index
    %c0_22 = arith.constant 0 : index
    %56 = vector.load %arg7[%c0_20, %c0_21, %c0_22] : memref<1x32x32xbf16, #tpu.memory_space<vmem>>, vector<1x32x32xbf16>
    %57 = vector.shape_cast %56 : vector<1x32x32xbf16> to vector<32x32xbf16>
    %cst_23 = arith.constant dense<0.000000e+00> : vector<8x32xf32>
    %58 = tpu.matmul %55, %57, %cst_23 {dimension_numbers = #tpu.dot_dimension_numbers<[1], [0], [0], [1], [0, 0, 1, 1], [], []>} : vector<8x32xbf16>, vector<32x32xbf16>, vector<8x32xf32> -> vector<8x32xf32>
    %59 = vector.broadcast %10 : vector<1x32xf32> to vector<8x32xf32>
    %60 = arith.addf %58, %59 : vector<8x32xf32>
    %61 = arith.addf %60, %3 : vector<8x32xf32>
    %cst_24 = arith.constant dense<0.000000e+00> : vector<8xf32>
    %62 = vector.multi_reduction <add>, %61, %cst_24 [1] : vector<8x32xf32> to vector<8xf32>
    %63 = vector.shape_cast %62 : vector<8xf32> to vector<8x1xf32>
    %cst_25 = arith.constant 3.200000e+01 : f32
    %64 = vector.broadcast %cst_25 : f32 to vector<8x1xf32>
    %65 = arith.divf %63, %64 : vector<8x1xf32>
    %66 = arith.mulf %61, %61 : vector<8x32xf32>
    %cst_26 = arith.constant dense<0.000000e+00> : vector<8xf32>
    %67 = vector.multi_reduction <add>, %66, %cst_26 [1] : vector<8x32xf32> to vector<8xf32>
    %68 = vector.shape_cast %67 : vector<8xf32> to vector<8x1xf32>
    %cst_27 = arith.constant 3.200000e+01 : f32
    %69 = vector.broadcast %cst_27 : f32 to vector<8x1xf32>
    %70 = arith.divf %68, %69 : vector<8x1xf32>
    %71 = arith.mulf %65, %65 : vector<8x1xf32>
    %72 = arith.subf %70, %71 : vector<8x1xf32>
    %73 = vector.broadcast %65 : vector<8x1xf32> to vector<8x32xf32>
    %74 = arith.subf %61, %73 : vector<8x32xf32>
    %cst_28 = arith.constant 9.99999996E-13 : f32
    %75 = vector.broadcast %cst_28 : f32 to vector<8x1xf32>
    %76 = arith.addf %72, %75 : vector<8x1xf32>
    %77 = math.rsqrt %76 : vector<8x1xf32>
    %78 = vector.broadcast %77 : vector<8x1xf32> to vector<8x32xf32>
    %79 = arith.mulf %74, %78 : vector<8x32xf32>
    %80 = vector.broadcast %11 : vector<1x32xf32> to vector<8x32xf32>
    %81 = arith.mulf %79, %80 : vector<8x32xf32>
    %82 = vector.broadcast %12 : vector<1x32xf32> to vector<8x32xf32>
    %83 = arith.addf %81, %82 : vector<8x32xf32>
    %84 = arith.truncf %83 : vector<8x32xf32> to vector<8x32xbf16>
    %c0_29 = arith.constant 0 : index
    %c0_30 = arith.constant 0 : index
    %c0_31 = arith.constant 0 : index
    %85 = vector.load %arg8[%c0_29, %c0_30, %c0_31] : memref<1x32x64xbf16, #tpu.memory_space<vmem>>, vector<1x32x64xbf16>
    %86 = vector.shape_cast %85 : vector<1x32x64xbf16> to vector<32x64xbf16>
    %cst_32 = arith.constant dense<0.000000e+00> : vector<8x64xf32>
    %87 = tpu.matmul %84, %86, %cst_32 {dimension_numbers = #tpu.dot_dimension_numbers<[1], [0], [0], [1], [0, 0, 1, 1], [], []>} : vector<8x32xbf16>, vector<32x64xbf16>, vector<8x64xf32> -> vector<8x64xf32>
    %c0_33 = arith.constant 0 : index
    %c0_34 = arith.constant 0 : index
    %c0_35 = arith.constant 0 : index
    %88 = vector.load %arg11[%c0_33, %c0_34, %c0_35] : memref<1x1x64xf32, #tpu.memory_space<vmem>>, vector<1x1x64xf32>
    %89 = vector.shape_cast %88 : vector<1x1x64xf32> to vector<1x64xf32>
    %90 = vector.broadcast %89 : vector<1x64xf32> to vector<8x64xf32>
    %91 = arith.addf %87, %90 : vector<8x64xf32>
    %92 = arith.mulf %91, %91 : vector<8x64xf32>
    %93 = arith.mulf %91, %92 : vector<8x64xf32>
    %cst_36 = arith.constant 4.471500e-02 : f32
    %94 = vector.broadcast %cst_36 : f32 to vector<8x64xf32>
    %95 = arith.mulf %94, %93 : vector<8x64xf32>
    %96 = arith.addf %91, %95 : vector<8x64xf32>
    %cst_37 = arith.constant 0.797884583 : f32
    %97 = vector.broadcast %cst_37 : f32 to vector<8x64xf32>
    %98 = arith.mulf %97, %96 : vector<8x64xf32>
    %99 = math.tanh %98 : vector<8x64xf32>
    %cst_38 = arith.constant 1.000000e+00 : f32
    %100 = vector.broadcast %cst_38 : f32 to vector<8x64xf32>
    %101 = arith.addf %100, %99 : vector<8x64xf32>
    %cst_39 = arith.constant 5.000000e-01 : f32
    %102 = vector.broadcast %cst_39 : f32 to vector<8x64xf32>
    %103 = arith.mulf %102, %101 : vector<8x64xf32>
    %104 = arith.mulf %91, %103 : vector<8x64xf32>
    %105 = arith.truncf %104 : vector<8x64xf32> to vector<8x64xbf16>
    %c0_40 = arith.constant 0 : index
    %c0_41 = arith.constant 0 : index
    %c0_42 = arith.constant 0 : index
    %106 = vector.load %arg9[%c0_40, %c0_41, %c0_42] : memref<1x64x32xbf16, #tpu.memory_space<vmem>>, vector<1x64x32xbf16>
    %107 = vector.shape_cast %106 : vector<1x64x32xbf16> to vector<64x32xbf16>
    %cst_43 = arith.constant dense<0.000000e+00> : vector<8x32xf32>
    %108 = tpu.matmul %105, %107, %cst_43 {dimension_numbers = #tpu.dot_dimension_numbers<[1], [0], [0], [1], [0, 0, 1, 1], [], []>} : vector<8x64xbf16>, vector<64x32xbf16>, vector<8x32xf32> -> vector<8x32xf32>
    %109 = vector.broadcast %13 : vector<1x32xf32> to vector<8x32xf32>
    %110 = arith.addf %108, %109 : vector<8x32xf32>
    %111 = arith.addf %110, %83 : vector<8x32xf32>
    %cst_44 = arith.constant dense<0.000000e+00> : vector<8xf32>
    %112 = vector.multi_reduction <add>, %111, %cst_44 [1] : vector<8x32xf32> to vector<8xf32>
    %113 = vector.shape_cast %112 : vector<8xf32> to vector<8x1xf32>
    %cst_45 = arith.constant 3.200000e+01 : f32
    %114 = vector.broadcast %cst_45 : f32 to vector<8x1xf32>
    %115 = arith.divf %113, %114 : vector<8x1xf32>
    %116 = arith.mulf %111, %111 : vector<8x32xf32>
    %cst_46 = arith.constant dense<0.000000e+00> : vector<8xf32>
    %117 = vector.multi_reduction <add>, %116, %cst_46 [1] : vector<8x32xf32> to vector<8xf32>
    %118 = vector.shape_cast %117 : vector<8xf32> to vector<8x1xf32>
    %cst_47 = arith.constant 3.200000e+01 : f32
    %119 = vector.broadcast %cst_47 : f32 to vector<8x1xf32>
    %120 = arith.divf %118, %119 : vector<8x1xf32>
    %121 = arith.mulf %115, %115 : vector<8x1xf32>
    %122 = arith.subf %120, %121 : vector<8x1xf32>
    %123 = vector.broadcast %115 : vector<8x1xf32> to vector<8x32xf32>
    %124 = arith.subf %111, %123 : vector<8x32xf32>
    %cst_48 = arith.constant 9.99999996E-13 : f32
    %125 = vector.broadcast %cst_48 : f32 to vector<8x1xf32>
    %126 = arith.addf %122, %125 : vector<8x1xf32>
    %127 = math.rsqrt %126 : vector<8x1xf32>
    %128 = vector.broadcast %127 : vector<8x1xf32> to vector<8x32xf32>
    %129 = arith.mulf %124, %128 : vector<8x32xf32>
    %130 = vector.broadcast %14 : vector<1x32xf32> to vector<8x32xf32>
    %131 = arith.mulf %129, %130 : vector<8x32xf32>
    %132 = vector.broadcast %15 : vector<1x32xf32> to vector<8x32xf32>
    %133 = arith.addf %131, %132 : vector<8x32xf32>
    %c0_49 = arith.constant 0 : index
    %c0_50 = arith.constant 0 : index
    %134 = vector.load %arg14[%c0_49, %c0_50] : memref<8x32xf32, #tpu.memory_space<vmem>>, vector<8x32xf32>
    tpu.vector_store %arg14[%c0_49, %c0_50], %133 {strides = array<i32>} : memref<8x32xf32, #tpu.memory_space<vmem>>, vector<8x32xf32>,
    %c1_i32 = arith.constant 1 : i32
    %135 = arith.cmpi eq, %arg0, %c1_i32 : i32
    %136 = arith.extui %135 : i1 to i32
    %c0_i32_51 = arith.constant 0 : i32
    %137 = arith.cmpi ne, %136, %c0_i32_51 : i32
    scf.if %137 {
      %138 = arith.truncf %133 : vector<8x32xf32> to vector<8x32xbf16>
      %c0_52 = arith.constant 0 : index
      %c0_53 = arith.constant 0 : index
      %139 = vector.load %arg12[%c0_52, %c0_53] : memref<32x4xbf16, #tpu.memory_space<vmem>>, vector<32x4xbf16>
      %cst_54 = arith.constant dense<0.000000e+00> : vector<8x4xf32>
      %140 = tpu.matmul %138, %139, %cst_54 {dimension_numbers = #tpu.dot_dimension_numbers<[1], [0], [0], [1], [0, 0, 1, 1], [], []>} : vector<8x32xbf16>, vector<32x4xbf16>, vector<8x4xf32> -> vector<8x4xf32>
      %c0_55 = arith.constant 0 : index
      %c0_56 = arith.constant 0 : index
      %141 = vector.load %arg13[%c0_55, %c0_56] : memref<1x4xf32, #tpu.memory_space<vmem>>, vector<1x4xf32>
      %142 = vector.broadcast %141 : vector<1x4xf32> to vector<8x4xf32>
      %143 = arith.addf %140, %142 : vector<8x4xf32>
      %cst_57 = arith.constant dense<0xFF800000> : vector<8xf32>
      %144 = vector.multi_reduction <maximumf>, %143, %cst_57 [1] : vector<8x4xf32> to vector<8xf32>
      %145 = vector.shape_cast %144 : vector<8xf32> to vector<8x1xf32>
      %146 = tpu.iota {dimensions = array<i32: 1>} : vector<8x4xi32>
      %147 = vector.broadcast %145 : vector<8x1xf32> to vector<8x4xf32>
      %148 = arith.cmpf oeq, %143, %147 : vector<8x4xf32>
      %c4_i32 = arith.constant 4 : i32
      %149 = vector.broadcast %c4_i32 : i32 to vector<8x4xi32>
      %150 = arith.select %148, %146, %149 : vector<8x4xi1>, vector<8x4xi32>
      %cst_58 = arith.constant dense<2147483647> : vector<8xi32>
      %151 = vector.multi_reduction <minsi>, %150, %cst_58 [1] : vector<8x4xi32> to vector<8xi32>
      %152 = vector.shape_cast %151 : vector<8xi32> to vector<8x1xi32>
      %c0_59 = arith.constant 0 : index
      %c0_60 = arith.constant 0 : index
      %153 = vector.load %arg15[%c0_59, %c0_60] : memref<8x1xi32, #tpu.memory_space<vmem>>, vector<8x1xi32>
      tpu.vector_store %arg15[%c0_59, %c0_60], %152 {strides = array<i32>} : memref<8x1xi32, #tpu.memory_space<vmem>>, vector<8x1xi32>,
    } else {
    }
    return
  }
  func.func @transform_0(%arg0: i32) -> (i32, i32) {
    %c0_i32 = arith.constant 0 : i32
    %c0_i32_0 = arith.constant 0 : i32
    %c0_i32_1 = arith.constant 0 : i32
    return %c0_i32, %c0_i32_0 : i32, i32
  }
  func.func @transform_1(%arg0: i32) -> (i32, i32) {
    %c0_i32 = arith.constant 0 : i32
    %c0_i32_0 = arith.constant 0 : i32
    %c0_i32_1 = arith.constant 0 : i32
    return %c0_i32, %c0_i32_0 : i32, i32
  }
  func.func @transform_2(%arg0: i32) -> (i32, i32) {
    %c0_i32 = arith.constant 0 : i32
    %c0_i32_0 = arith.constant 0 : i32
    %c0_i32_1 = arith.constant 0 : i32
    return %c0_i32, %c0_i32_0 : i32, i32
  }
  func.func @transform_3(%arg0: i32) -> (i32, i32, i32) {
    %c0_i32 = arith.constant 0 : i32
    %c0_i32_0 = arith.constant 0 : i32
    %c0_i32_1 = arith.constant 0 : i32
    return %arg0, %c0_i32, %c0_i32_0 : i32, i32, i32
  }
  func.func @transform_4(%arg0: i32) -> (i32, i32, i32) {
    %c0_i32 = arith.constant 0 : i32
    %c0_i32_0 = arith.constant 0 : i32
    %c0_i32_1 = arith.constant 0 : i32
    return %arg0, %c0_i32, %c0_i32_0 : i32, i32, i32
  }
  func.func @transform_5(%arg0: i32) -> (i32, i32, i32) {
    %c0_i32 = arith.constant 0 : i32
    %c0_i32_0 = arith.constant 0 : i32
    %c0_i32_1 = arith.constant 0 : i32
    return %arg0, %c0_i32, %c0_i32_0 : i32, i32, i32
  }
  func.func @transform_6(%arg0: i32) -> (i32, i32, i32) {
    %c0_i32 = arith.constant 0 : i32
    %c0_i32_0 = arith.constant 0 : i32
    %c0_i32_1 = arith.constant 0 : i32
    return %arg0, %c0_i32, %c0_i32_0 : i32, i32, i32
  }
  func.func @transform_7(%arg0: i32) -> (i32, i32, i32) {
    %c0_i32 = arith.constant 0 : i32
    %c0_i32_0 = arith.constant 0 : i32
    %c0_i32_1 = arith.constant 0 : i32
    return %arg0, %c0_i32, %c0_i32_0 : i32, i32, i32
  }
  func.func @transform_8(%arg0: i32) -> (i32, i32, i32) {
    %c0_i32 = arith.constant 0 : i32
    %c0_i32_0 = arith.constant 0 : i32
    %c0_i32_1 = arith.constant 0 : i32
    return %arg0, %c0_i32, %c0_i32_0 : i32, i32, i32
  }
  func.func @transform_9(%arg0: i32) -> (i32, i32, i32) {
    %c0_i32 = arith.constant 0 : i32
    %c0_i32_0 = arith.constant 0 : i32
    %c0_i32_1 = arith.constant 0 : i32
    return %arg0, %c0_i32, %c0_i32_0 : i32, i32, i32
  }
  func.func @transform_10(%arg0: i32) -> (i32, i32, i32) {
    %c0_i32 = arith.constant 0 : i32
    %c0_i32_0 = arith.constant 0 : i32
    %c0_i32_1 = arith.constant 0 : i32
    return %arg0, %c0_i32, %c0_i32_0 : i32, i32, i32
  }
  func.func @transform_11(%arg0: i32) -> (i32, i32) {
    %c0_i32 = arith.constant 0 : i32
    %c0_i32_0 = arith.constant 0 : i32
    %c0_i32_1 = arith.constant 0 : i32
    return %c0_i32, %c0_i32_0 : i32, i32
  }
  func.func @transform_12(%arg0: i32) -> (i32, i32) {
    %c0_i32 = arith.constant 0 : i32
    %c0_i32_0 = arith.constant 0 : i32
    %c0_i32_1 = arith.constant 0 : i32
    return %c0_i32, %c0_i32_0 : i32, i32
  }
  func.func @transform_13(%arg0: i32) -> (i32, i32) {
    %c0_i32 = arith.constant 0 : i32
    %c0_i32_0 = arith.constant 0 : i32
    %c0_i32_1 = arith.constant 0 : i32
    return %c0_i32, %c0_i32_0 : i32, i32
  }
  func.func @transform_14(%arg0: i32) -> (i32, i32) {
    %c0_i32 = arith.constant 0 : i32
    %c0_i32_0 = arith.constant 0 : i32
    %c0_i32_1 = arith.constant 0 : i32
    return %c0_i32, %c0_i32_0 : i32, i32
  }
}

</mosaic_0001>

<bundles_post_ra>
// kernel: tpu_custom_call.1
= control target key start
LH: loop header
LB: loop body
LE: loop exit
PB: predicated region body
PF: predicated region fallthrough
CT: control target
= control target key end

     0   :  { %s2428_s0 = inlined_call_operand.hbm [shape: f32[8,32], index: 0, kind: input, shape index: {}]   ;;  %s2429_s1 = inlined_call_operand.vmem [shape: f32[1,32], index: 1, kind: input, shape index: {}]   ;;  %s2430_s2 = inlined_call_operand.vmem [shape: f32[1,32], index: 2, kind: input, shape index: {}]   ;;  %s2431_s3 = inlined_call_operand.vmem [shape: bf16[2,32,32], index: 3, kind: input, shape index: {}]   ;;  %s2432_s4 = inlined_call_operand.vmem [shape: bf16[2,32,32], index: 4, kind: input, shape index: {}]   ;;  %s2433_s5 = inlined_call_operand.vmem [shape: bf16[2,32,32], index: 5, kind: input, shape index: {}]   ;;  %s2434_s6 = inlined_call_operand.vmem [shape: bf16[2,32,32], index: 6, kind: input, shape index: {}]   ;;  %s2435_s7 = inlined_call_operand.hbm [shape: bf16[2,32,64], index: 7, kind: input, shape index: {}]   ;;  %s2436_s8 = inlined_call_operand.vmem [shape: bf16[2,64,32], index: 8, kind: input, shape index: {}]   ;;  %s2437_s9 = inlined_call_operand.vmem [shape: f32[2,9,32], index: 9, kind: input, shape index: {}]   ;;  %s2438_s10 = inlined_call_operand.vmem [shape: f32[2,1,64], index: 10, kind: input, shape index: {}]   ;;  %s2439_s11 = inlined_call_operand.vmem [shape: bf16[32,4], index: 11, kind: input, shape index: {}]   ;;  %s2440_s12 = inlined_call_operand.vmem [shape: f32[1,4], index: 12, kind: input, shape index: {}]   ;;  %s2441_s13 = inlined_call_operand.hbm [shape: f32[8,32], index: 13, kind: output, shape index: {0}]   ;;  %s2442_s14 = inlined_call_operand.vmem [shape: s32[8,1], index: 14, kind: output, shape index: {1}]  }
   0x1   :  { %2446 = sst [smem:[#allocation14_spill]] %s2428_s0 }
   0x2   :  { %2447 = sst [smem:[#allocation15_spill]] %s2431_s3 }
   0x3   :  { %2448 = sst [smem:[#allocation16_spill]] %s2432_s4 }
   0x4   :  { %2449 = sst [smem:[#allocation17_spill]] %s2440_s12 }
   0x5   :  { %2450 = sst [smem:[#allocation18_spill]] %s2441_s13 }
   0x6   :  { %2451 = sst [smem:[#allocation19_spill]] %s2442_s14 }
   0x7   :  { %20 = vsyncpa [#allocation3], 0 }
   0x8   :  { %21 = vsyncpa [#allocation6], 0 }
   0x9   :  { %23 = vsyncpa [#allocation6 + $0x1], 0 }
   0xa   :  { %24 = vsyncpa [#allocation4], 0  ;;  %s2083_s29 = smov 0   ;;  %s2085_s30 = smov 0  }
   0xb   :  { %s2087_s15 = smov 0   ;;  %s2089_s16 = smov 0  }
   0xc LB: > { %2452 = sst [smem:[#allocation11_spill]] %s1992_s15  ;;  %s2102_s17 = sadd.s32 4294967295, %s1996_s16   ;;  %s1996_s16 = sphi %s2089_s16, %s2467_s16   ;;  %s1992_s15 = sphi %s2087_s15, %s2469_s15   ;;  %s1988_s30 = sphi %s2085_s30, %s2471_s30   ;;  %s1984_s29 = sphi %s2083_s29, %s2470_s29  }
   0xd   : > { %s2105_s18 = sadd.s32 1, %s1996_s16   ;;  %s204_s20 = sadd.s32 1, %s1992_s15 }
   0xe   : > { %2453 = sst [smem:[#allocation12_spill]] %s2105_s18  ;;  %s201_s19 = ssub.s32 %s1996_s16, %s2105_s18 }
   0xf   : > { %p202_p0 = scmp.eq.s32.totalorder %s201_s19, 0  ;;  %p211_p1 = scmp.ne.s32.totalorder %s1992_s15, %s1988_s30 }
  0x10   : > { %p212_p2 = scmp.eq.s32.totalorder %s1996_s16, 0  ;;  %p217_p3 = scmp.ne.s32.totalorder %s1988_s30, %s1984_s29 }
  0x11   : > { %s2115_s21 = scalar_select %p202_p0, %s1992_s15, %s204_s20  }
  0x12   : > { %p2117_p4 = por %p212_p2, %p211_p1  ;;  %p218_p5 = scmp.eq.s32.totalorder %s2102_s17, 0 }
  0x13   : > { %2454 = sst [smem:[#allocation13_spill]] %s2115_s21  ;;  %p1651_p6 = scmp.ge.s32.totalorder %s1996_s16, 1 }
  0x14   : > { %p390_p7 = scmp.lt.s32.totalorder %s1996_s16, 3  ;;  %p2126_p8 = por %p218_p5, %p217_p3 }
  0x15   : > { %p1652_p9 = scmp.ne.s32.totalorder %s2102_s17, 0  ;;  %s2458_s0 = sld [smem:[#allocation14_spill]] }
  0x16   : > { %p2131_p10 = pnand %p1651_p6, %p390_p7  ;;  %s1998_s28 = smov [#allocation2]  }
  0x17   : > { %s404_s29 = sshll.u32 %s1998_s28, 4  ;;  %p1795_p13 = scmp.lt.s32.totalorder %s1996_s16, 2  ;;  %s405_s29 = int_to_ptr.vmem [resolvable:$true] %s404_s29 }
  0x18   : > { %p1786_p11 = pneg %p2131_p10  ;;  %s459_s19 = sand.u32 1, %s1992_s15  }
  0x19   : > { %s1753_s20 = sshll.u32 %s1996_s16, 4  ;;  %p2147_p0 = pnand %p1795_p13, %p2117_p4 }
  0x1a   : > { %p1787_p12 = pnand %p1786_p11, %p218_p5  ;;  %s1654_s25 = sshll.u32 %s459_s19, 4 }
  0x1b   : > { %s402_s27 = sshll.u32 %s2458_s0, 4  ;;  %s468_s18 = scalar_lea.hbm %s2435_s7, %s1753_s20  ;;  %s403_s27 = int_to_ptr.hbm [resolvable:$true] %s402_s27 }
  0x1c   : > { %1789 = dma.hbm_to_vmem [thread:$0]  (!%p1787_p12), %s403_s27, 128, %s405_s29, [#allocation3]  }
  0x1d   : > { %s469_s13 = sshll.u32 %s468_s18, 4  ;;  %s463_s28 = scalar_lea.vmem [#allocation5], %s1654_s25  ;;  %s470_s13 = int_to_ptr.hbm [resolvable:$true] %s469_s13 }
  0x1e   : > { %s471_s14 = sshll.u32 %s463_s28, 4  ;;  %s460_s12 = scalar_lea.sflag [#allocation6], %s459_s19  ;;  %s472_s14 = int_to_ptr.vmem [resolvable:$true] %s471_s14 }
  0x1f   : > { %s1896_s15 = sshra.s32 %s470_s13, 4  ;;  %p1900_p2 = pneg %p2147_p0  ;;  %s1897_s15 = int_to_ptr.hbm [resolvable:$true] %s1896_s15 }
  0x20   : > { %s1898_s16 = scalar_lea.hbm %s1897_s15, 16  ;;  %s1903_s29 = scalar_lea.hbm %s2435_s7, 32 }
  0x21   : > { %p1899_p1 = scmp.ne.s32.totalorder %s1897_s15, %s1898_s16  ;;  %p1904_p6 = scmp.lt.s32.totalorder %s1897_s15, %s2435_s7 }
  0x22   : > { %p1905_p7 = scmp.lt.s32.totalorder %s1903_s29, %s1898_s16 }
  0x23   : > { %p1901_p3 = pnand %p1900_p2, %p1899_p1 }
  0x24   : > { %p1906_p11 = por %p1905_p7, %p1904_p6 }
  0x25   : > { %p1902_p4 = pneg %p1901_p3 }
  0x27   : > { %p1907_p12 = pnand %p1906_p11, %p1902_p4 }
  0x29   : > { %1910 = shalt.err (!%p1907_p12)
}
  0x2a   : > { %s1999_s18 = smov 64   ;;  %s2000_s19 = smov 4  }
  0x2b   : > { %1793 = dma.hbm_to_vmem [thread:$0]  (!%p2147_p0), %s470_s13, 256, %s472_s14, %s460_s12, %s1999_s18, %s1999_s18, %s2000_s19  }
  0x2c   : > { %505 = sbr.rel (%p2131_p10) target bundleno = 2409 (0x969), region = 72 }
  0x31   : > { %1971 = dma.done.wait (%p218_p5), [#allocation3], 128  }
  0x32   : > { %1973 = vsyncadd (%p218_p5), [#allocation3], 4294967168  ;;  %s512_s15 = sand.u32 1, %s1988_s30  }
  0x33   : > { %s2171_s25 = sshll.u32 %s512_s15, 4  ;;  %s513_s26 = scalar_lea.sflag [#allocation6], %s512_s15 }
  0x34   : > { %1975 = dma.done.wait (%p2126_p8), %s513_s26, 256  }
  0x35   : > { %1977 = vsyncadd (%p2126_p8), %s513_s26, 4294967040  ;;  %p590_p10 = scmp.lt.s32.totalorder %s2102_s17, 1  ;;  %s2460_s3 = sld [smem:[#allocation15_spill]] }
  0x36   : > { %s2461_s4 = sld [smem:[#allocation16_spill]] }
  0x37   : > { %s2180_s12 = scalar_select %p590_p10, %s2102_s17, 1 }
  0x39   : > { %s1754_s13 = sshll.u32 %s2180_s12, 4  ;;  %s1758_s14 = sshll.u32 %s2180_s12, 5 }
  0x3a   : > { %s2197_s20 = scalar_lea.vmem %s2433_s5, %s1754_s13  ;;  %s2202_s15 = scalar_lea.vmem %s2434_s6, %s1754_s13 }
  0x3b   : > { %s2187_s16 = scalar_lea.vmem %s2460_s3, %s1754_s13  ;;  %s2207_s21 = scalar_lea.vmem %s2436_s8, %s1758_s14 }
  0x3c   : > { %s2192_s23 = scalar_lea.vmem %s2461_s4, %s1754_s13  ;;  %s2212_s22 = scalar_lea.vmem %s2437_s9, %s1754_s13 }
  0x3d   : > { %s622_s29 = scalar_lea.vmem %s2438_s10, %s2180_s12  ;;  %627 = sbr.rel (%p1652_p9) target bundleno = 223 (0xdf), region = 84 }
  0x42   : > { %v628_v0 = vld [vmem:[#allocation2] sm:$0xff]  ;;  %vm631_vm0 = vcmask 261120   ;;  %v2001_v4 = vmov 32.0  }
  0x43   : > { %v632_v1 = vsel %vm631_vm0, %v628_v0, 0.0  ;;  %v643_v2 = vmul.f32 %v628_v0, %v628_v0  ;;  %1843 = vrcp.f32 %v2001_v4  ;;  %v1841_v25 = vld [vmem:[%s2429_s1] ss:$0 sm:$0xff] }
  0x44   : > { %633 = vadd.xlane.f32.xlu0 %v632_v1  ;;  %v1842_v27 = vld [vmem:[%s2430_s2] ss:$0 sm:$0xff] }
  0x45   : > { %v644_v3 = vsel %vm631_vm0, %v643_v2, 0.0 }
  0x49   : > { %v1844_v5 = vpop.eup %1843 }
  0x4a   : > { %v636_v6 = vmul.f32 32.0, %v1844_v5  ;;  %vm640_vm1 = vweird.f32 %v1844_v5 }
  0x4c   : > { %645 = vadd.xlane.f32.xlu0 %v644_v3  ;;  %v637_v7 = vsub.f32 1.0, %v636_v6 }
  0x4e   : > { %v638_v8 = vmul.f32 %v1844_v5, %v637_v7 }
  0x50   : > { %v639_v9 = vadd.f32 %v1844_v5, %v638_v8 }
  0x52   : > { %v641_v11 = vsel %vm640_vm1, %v1844_v5, %v639_v9 }
  0xb7   : > { %v634_v10 = vpop.xlane.xlu0 %633 }
  0xb8   : > { %v642_v12 = vmul.f32 %v641_v11, %v634_v10 }
  0xba   : > { %v648_v14 = vmul.f32 %v642_v12, %v642_v12  ;;  %v650_v24 = vsub.f32 %v628_v0, %v642_v12 }
  0xbf   : > { %v646_v13 = vpop.xlane.xlu0 %645 }
  0xc0   : > { %v647_v15 = vmul.f32 %v646_v13, %v641_v11 }
  0xc2   : > { %v649_v16 = vsub.f32 %v647_v15, %v648_v14 }
  0xc4   : > { %v651_v17 = vadd.f32 1e-12, %v649_v16 }
  0xc6   : > { %1845 = vrsqrt.f32 %v651_v17  ;;  %vm658_vm3 = vweird.f32 %v651_v17 }
  0xcc   : > { %v1846_v18 = vpop.eup %1845 }
  0xcd   : > { %v653_v19 = vmul.f32 %v1846_v18, %v651_v17  ;;  %vm659_vm2 = vweird.f32 %v1846_v18 }
  0xce   : > { %vm660_vm4 = vmor %vm658_vm3, %vm659_vm2 }
  0xcf   : > { %v654_v20 = vmul.f32 %v1846_v18, %v653_v19 }
  0xd1   : > { %v655_v21 = vmul.f32 0.5, %v654_v20 }
  0xd3   : > { %v656_v22 = vsub.f32 1.5, %v655_v21 }
  0xd5   : > { %v657_v23 = vmul.f32 %v1846_v18, %v656_v22 }
  0xd7   : > { %v661_v26 = vsel %vm660_vm4, %v1846_v18, %v657_v23 }
  0xd8   : > { %v662_v28 = vmul.f32 %v661_v26, %v650_v24 }
  0xda   : > { %v666_v29 = vmul.f32 %v1841_v25, %v662_v28 }
  0xdc   : > { %v670_v30 = vadd.f32 %v1842_v27, %v666_v29 }
  0xde   : > { %671 = vst.msk [vmem:[#allocation7] sm:$0xff] %vm631_vm0, %v670_v30 }
  0xdf PF: > { %v1763_v31 = vld [vmem:[%s2192_s23 + $0x8] sm:$0xff]  ;;  %v1762_v32 = vld [vmem:[%s2192_s23] sm:$0xff]  ;;  %vm693_vm5 = vcmask 261120   ;;  %s2002_s14 = smov 112   ;;  %v2003_v50 = vmov 1983009808  }
  0xe0   : > { %v1761_v33 = vld [vmem:[%s2187_s16 + $0x8] sm:$0xff]  ;;  %733 = vmatpush.bf16.msra.mxu1 %v1763_v31  ;;  %v1760_v35 = vld [vmem:[%s2187_s16] sm:$0xff]  ;;  %v782_v51 = vunpack.c.l.s4 %v2003_v50  ;;  %v2004_v52 = vmov 1934713408   ;;  %vm786_vm6 = vcmask 1047556   ;;  %vm1035_vm7 = vcmask 130048  }
  0xe1   : > { %703 = vmatpush.bf16.msra.mxu0 %v1761_v33  ;;  %v2240_v37 = vld [vmem:[%s2212_s22] sm:$0xff]  ;;  %v1765_v48 = vld [vmem:[%s2197_s20 + $0x8] sm:$0xff]  ;;  %v789_v53 = vunpack.c.l.s4 %v2004_v52  ;;  %vm1074_vm8 = vcmask 64512   ;;  %vm1102_vm9 = vcmask 1043456   ;;  %s2005_s16 = smov 16   ;;  %s2462_s23 = scalar_lea.vmem [#allocation5], %s2171_s25 }
  0xe2   : > { %v714_v38 = vperm.slane %v2240_v37, 1  ;;  %v680_v41 = vperm.slane %v2240_v37, 0  ;;  %763 = vmatpush.bf16.msra.mxu2 %v1765_v48  ;;  %v1764_v49 = vld [vmem:[%s2197_s20] sm:$0xff]  ;;  %v2249_v54 = vunpack.c.0.s8 %v782_v51  ;;  %s2463_s0 = smov %s2462_s23  ;;  %vm1379_vm14 = vcmask 523264   ;;  %p1739_p5 = scmp.ne.s32.totalorder %s2102_s17, 1 }
  0xe3   : > { %v2251_v57 = vunpack.c.0.s8 %v789_v53  ;;  %s2464_s24 = sld [smem:[#allocation17_spill]] (!%p1739_p5) }
  0xe4   : > { %734 = vmatpush.bf16.msra.mxu1 %v1762_v32 }
  0xe5   : > { %v2232_v34 = vld [vmem:[#allocation7] sm:$0xff]  ;;  %704 = vmatpush.bf16.msra.mxu0 %v1760_v35 }
  0xe6   : > { %v673_v36 = vpack.c.bf16 %v2232_v34, %v2232_v34  ;;  %764 = vmatpush.bf16.msra.mxu2 %v1764_v49 }
  0xe8   : > { %1690 = vmatmul.msk.bf16.vlgmr.msra.gmra.mxu1 %vm693_vm5, %v673_v36  ;;  %1681 = vmatmul.msk.bf16.vlgmr.msra.gmra.mxu0 %vm693_vm5, %v673_v36 }
  0xe9   : > { %1699 = vmatmul.msk.bf16.vlgmr.msra.gmra.mxu2 %vm693_vm5, %v673_v36 }
 0x165   : > { %v736_v39 = vpop.f32.mrf.mxu1  ;;  %v706_v42 = vpop.f32.mrf.mxu0 }
 0x166   : > { %v737_v40 = vadd.f32 %v736_v39, %v714_v38  ;;  %v707_v44 = vadd.f32 %v706_v42, %v680_v41 }
 0x168   : > { %v859_v43 = vpack.c.bf16 %v737_v40, %v737_v40  ;;  %v770_v46 = vpack.c.bf16 %v707_v44, %v707_v44 }
 0x16a   : > { %861 = vrot.lane.b32.xlu0 %v859_v43, %s2002_s14  ;;  %v866_v56 = vshrl.u32 %v859_v43, 16  ;;  %v777_v9 = vshrl.u32 %v770_v46, 16 }
 0x16d   : > { %v738_v45 = vpop.f32.mrf.mxu1  ;;  %v708_v47 = vpop.f32.mrf.mxu0 }
 0x172   : > { %772 = vrot.lane.b32.xlu0 %v770_v46, %s2002_s14 }
 0x1dc   : > { %v862_v55 = vpop.permute.xlu0 %861 }
 0x1dd   : > { %v865_v58 = vpack.i.b16 %v862_v55, %v859_v43  ;;  %v867_v59 = vshrl.u32 %v862_v55, 16 }
 0x1df   : > { %v868_v60 = vpack.i.b16 %v867_v59, %v866_v56  ;;  %v873_v61 = vperm.slane %v865_v58, %v2249_v54 }
 0x1e1   : > { %v874_v62 = vrot.slane %v873_v61, 4  ;;  %v879_v63 = vperm.slane %v873_v61, %v2251_v57  ;;  %v892_v0 = vperm.slane %v868_v60, %v2249_v54 }
 0x1e3   : > { %v875_v1 = vsel %vm786_vm6, 0, %v874_v62  ;;  %v893_v2 = vrot.slane %v892_v0, 4  ;;  %v898_v4 = vperm.slane %v892_v0, %v2251_v57  ;;  %v884_v6 = vrot.slane %v879_v63, 4 }
 0x1e4   : > { %v883_v3 = vperm.slane %v875_v1, %v2251_v57  ;;  %v773_v5 = vpop.permute.xlu0 %772 }
 0x1e5   : > { %v894_v7 = vsel %vm786_vm6, 0, %v893_v2  ;;  %v776_v8 = vpack.i.b16 %v773_v5, %v770_v46  ;;  %v778_v12 = vshrl.u32 %v773_v5, 16  ;;  %v903_v15 = vrot.slane %v898_v4, 4 }
 0x1e6   : > { %v886_v10 = vrot.slane %v883_v3, 4  ;;  %v902_v11 = vperm.slane %v894_v7, %v2251_v57  ;;  %v885_v18 = vsel %vm786_vm6, 0, %v884_v6 }
 0x1e7   : > { %v784_v13 = vperm.slane %v776_v8, %v2249_v54  ;;  %v779_v17 = vpack.i.b16 %v778_v12, %v777_v9  ;;  %v904_v28 = vsel %vm786_vm6, 0, %v903_v15 }
 0x1e8   : > { %v887_v14 = vsel %vm786_vm6, 0, %v886_v10  ;;  %v905_v16 = vrot.slane %v902_v11, 4  ;;  %v907_v24 = vsel %vm786_vm6, %v886_v10, %v879_v63 }
 0x1e9   : > { %v912_v19 = vrot.slane %v887_v14, 4  ;;  %v785_v20 = vrot.slane %v784_v13, 4  ;;  %v791_v22 = vperm.slane %v784_v13, %v2251_v57  ;;  %v804_v23 = vperm.slane %v779_v17, %v2249_v54 }
 0x1ea   : > { %v906_v21 = vsel %vm786_vm6, 0, %v905_v16  ;;  %v911_v33 = vperm.slane %v907_v24, %v2249_v54  ;;  %v924_v42 = vsel %vm786_vm6, %v905_v16, %v898_v4 }
 0x1eb   : > { %v929_v25 = vrot.slane %v906_v21, 4  ;;  %v787_v26 = vsel %vm786_vm6, 0, %v785_v20  ;;  %v913_v27 = vsel %vm786_vm6, %v912_v19, %v885_v18  ;;  %v805_v30 = vrot.slane %v804_v23, 4  ;;  %v766_v21 = vpop.f32.mrf.mxu2 }
 0x1ec   : > { %v795_v29 = vperm.slane %v787_v26, %v2251_v57  ;;  %v917_v31 = vperm.slane %v913_v27, %v2249_v54  ;;  %v810_v32 = vperm.slane %v804_v23, %v2251_v57  ;;  %v796_v36 = vrot.slane %v791_v22, 4 }
 0x1ed   : > { %v930_v35 = vsel %vm786_vm6, %v929_v25, %v904_v28  ;;  %v806_v39 = vsel %vm786_vm6, 0, %v805_v30  ;;  %v928_v50 = vperm.slane %v924_v42, %v2249_v54  ;;  %v744_v20 = vperm.slane %v2240_v37, 2 }
 0x1ee   : > { %v798_v38 = vrot.slane %v795_v29, 4  ;;  %v918_v40 = vrot.slane %v917_v31, 4  ;;  %v814_v41 = vperm.slane %v806_v39, %v2251_v57  ;;  %v934_v43 = vperm.slane %v930_v35, %v2249_v54 }
 0x1ef   : > { %v815_v46 = vrot.slane %v810_v32, 4  ;;  %v797_v49 = vsel %vm786_vm6, 0, %v796_v36 }
 0x1f0   : > { %v799_v44 = vsel %vm786_vm6, 0, %v798_v38  ;;  %v919_v45 = vsel %vm786_vm6, %v918_v40, %v911_v33  ;;  %v817_v47 = vrot.slane %v814_v41, 4  ;;  %v935_v51 = vrot.slane %v934_v43, 4 }
 0x1f1   : > { %v824_v48 = vrot.slane %v799_v44, 4  ;;  %v819_v53 = vsel %vm786_vm6, %v798_v38, %v791_v22  ;;  %v923_v56 = vperm.slane %v919_v45, %v2251_v57  ;;  %v816_v61 = vsel %vm786_vm6, 0, %v815_v46 }
 0x1f2   : > { %v818_v52 = vsel %vm786_vm6, 0, %v817_v47  ;;  %v936_v59 = vsel %vm786_vm6, %v935_v51, %v928_v50  ;;  %v823_v63 = vperm.slane %v819_v53, %v2249_v54  ;;  %v836_v0 = vsel %vm786_vm6, %v817_v47, %v810_v32 }
 0x1f3   : > { %v825_v55 = vsel %vm786_vm6, %v824_v48, %v797_v49  ;;  %v841_v58 = vrot.slane %v818_v52, 4  ;;  %v940_v62 = vperm.slane %v936_v59, %v2251_v57  ;;  %v944_v4 = vshrl.u32 %v923_v56, 16  ;;  %v768_v24 = vpop.f32.mrf.mxu2 }
 0x1f4   : > { %v829_v60 = vperm.slane %v825_v55, %v2249_v54  ;;  %v840_v10 = vperm.slane %v836_v0, %v2249_v54  ;;  %v767_v22 = vadd.f32 %v766_v21, %v744_v20 }
 0x1f5   : > { %v842_v2 = vsel %vm786_vm6, %v841_v58, %v816_v61  ;;  %v943_v3 = vpack.i.b16 %v940_v62, %v923_v56  ;;  %v945_v5 = vshrl.u32 %v940_v62, 16 }
 0x1f6   : > { %v830_v1 = vrot.slane %v829_v60, 4  ;;  %v846_v6 = vperm.slane %v842_v2, %v2249_v54  ;;  %v947_v23 = vpack.c.bf16 %v767_v22, %v767_v22 }
 0x1f7   : > { %v1040_v8 = vsel %vm1035_vm7, %v943_v3, 0  ;;  %v946_v9 = vpack.i.b16 %v945_v5, %v944_v4 }
 0x1f8   : > { %v831_v7 = vsel %vm786_vm6, %v830_v1, %v823_v63  ;;  %v847_v11 = vrot.slane %v846_v6, 4  ;;  %1049 = vmatpush.bf16.xpose.msra.mxu3 %v1040_v8  ;;  %949 = vrot.lane.b32.xlu2 %v947_v23, %s2002_s14  ;;  %v954_v31 = vshrl.u32 %v947_v23, 16 }
 0x1f9   : > { %v835_v12 = vperm.slane %v831_v7, %v2251_v57  ;;  %v1059_v13 = vsel %vm1035_vm7, %v946_v9, 0 }
 0x1fa   : > { %v848_v14 = vsel %vm786_vm6, %v847_v11, %v840_v10  ;;  %1068 = vmatpush.bf16.xpose.msrb.mxu0 %v1059_v13 }
 0x1fb   : > { %v852_v15 = vperm.slane %v848_v14, %v2251_v57  ;;  %v856_v17 = vshrl.u32 %v835_v12, 16 }
 0x1fd   : > { %v855_v16 = vpack.i.b16 %v852_v15, %v835_v12  ;;  %v857_v18 = vshrl.u32 %v852_v15, 16 }
 0x1ff   : > { %v858_v19 = vpack.i.b16 %v857_v18, %v856_v17  ;;  %1700 = vmatmul.msk.bf16.vlgmr.msra.gmra.mxu3 %vm1035_vm7, %v855_v16 }
 0x201   : > { %1701 = vmatmul.msk.bf16.vlgmr.msrb.gmra.mxu0 %vm1035_vm7, %v858_v19 }
 0x252   : > { %v950_v32 = vpop.permute.xlu2 %949 }
 0x253   : > { %v953_v33 = vpack.i.b16 %v950_v32, %v947_v23  ;;  %v955_v35 = vshrl.u32 %v950_v32, 16 }
 0x255   : > { %v956_v36 = vpack.i.b16 %v955_v35, %v954_v31  ;;  %v961_v38 = vperm.slane %v953_v33, %v2249_v54 }
 0x257   : > { %v962_v39 = vrot.slane %v961_v38, 4  ;;  %v967_v40 = vperm.slane %v961_v38, %v2251_v57  ;;  %v980_v41 = vperm.slane %v956_v36, %v2249_v54 }
 0x259   : > { %v963_v42 = vsel %vm786_vm6, 0, %v962_v39  ;;  %v981_v43 = vrot.slane %v980_v41, 4  ;;  %v986_v44 = vperm.slane %v980_v41, %v2251_v57  ;;  %v972_v46 = vrot.slane %v967_v40, 4 }
 0x25a   : > { %v971_v45 = vperm.slane %v963_v42, %v2251_v57 }
 0x25b   : > { %v982_v47 = vsel %vm786_vm6, 0, %v981_v43  ;;  %v991_v50 = vrot.slane %v986_v44, 4  ;;  %v973_v51 = vsel %vm786_vm6, 0, %v972_v46  ;;  %v1767_v43 = vld [vmem:[%s2202_s15 + $0x8] sm:$0xff]  ;;  %v1766_v46 = vld [vmem:[%s2202_s15] sm:$0xff] }
 0x25c   : > { %v974_v48 = vrot.slane %v971_v45, 4  ;;  %v990_v49 = vperm.slane %v982_v47, %v2251_v57  ;;  %1256 = vmatpush.bf16.msrb.mxu3 %v1767_v43 }
 0x25d   : > { %v992_v58 = vsel %vm786_vm6, 0, %v991_v50 }
 0x25e   : > { %v975_v52 = vsel %vm786_vm6, 0, %v974_v48  ;;  %v993_v53 = vrot.slane %v990_v49, 4  ;;  %v995_v55 = vsel %vm786_vm6, %v974_v48, %v967_v40 }
 0x25f   : > { %v1000_v56 = vrot.slane %v975_v52, 4  ;;  %v999_v63 = vperm.slane %v995_v55, %v2249_v54 }
 0x260   : > { %v994_v59 = vsel %vm786_vm6, 0, %v993_v53  ;;  %v1012_v62 = vsel %vm786_vm6, %v993_v53, %v986_v44  ;;  %1257 = vmatpush.bf16.msrb.mxu3 %v1766_v46 }
 0x261   : > { %v1017_v60 = vrot.slane %v994_v59, 4  ;;  %v1001_v61 = vsel %vm786_vm6, %v1000_v56, %v973_v51  ;;  %v1016_v3 = vperm.slane %v1012_v62, %v2249_v54 }
 0x262   : > { %v1005_v0 = vperm.slane %v1001_v61, %v2249_v54 }
 0x263   : > { %v1018_v1 = vsel %vm786_vm6, %v1017_v60, %v992_v58 }
 0x264   : > { %v1006_v2 = vrot.slane %v1005_v0, 4  ;;  %v1022_v4 = vperm.slane %v1018_v1, %v2249_v54 }
 0x266   : > { %v1007_v5 = vsel %vm786_vm6, %v1006_v2, %v999_v63  ;;  %v1023_v6 = vrot.slane %v1022_v4, 4 }
 0x267   : > { %v1011_v7 = vperm.slane %v1007_v5, %v2251_v57 }
 0x268   : > { %v1024_v8 = vsel %vm786_vm6, %v1023_v6, %v1016_v3 }
 0x269   : > { %v1028_v9 = vperm.slane %v1024_v8, %v2251_v57  ;;  %v1032_v10 = vshrl.u32 %v1011_v7, 16 }
 0x26b   : > { %v1031_v11 = vpack.i.b16 %v1028_v9, %v1011_v7  ;;  %v1033_v12 = vshrl.u32 %v1028_v9, 16 }
 0x26d   : > { %v1104_v13 = vsel %vm1102_vm9, %v1031_v11, 0  ;;  %v1034_v14 = vpack.i.b16 %v1033_v12, %v1032_v10 }
 0x26e   : > { %1113 = vmatpush.bf16.msrb.mxu1 %v1104_v13 }
 0x26f   : > { %v1123_v15 = vsel %vm1102_vm9, %v1034_v14, 0 }
 0x270   : > { %1132 = vmatpush.bf16.msrb.mxu2 %v1123_v15 }
 0x27e   : > { %v1070_v25 = vpop.f32.mrf.mxu0 }
 0x27f   : > { %v1078_v26 = vsel %vm1074_vm8, %v1070_v25, -inf }
 0x280   : > { %1079 = vmax.xlane.f32.xlu1 %v1078_v26 }
 0x282   : > { %v1051_v27 = vpop.f32.mrf.mxu3 }
 0x283   : > { %v1075_v29 = vsel %vm1074_vm8, %v1051_v27, -inf }
 0x286   : > { %v1072_v28 = vpop.f32.mrf.mxu0 }
 0x288   : > { %1076 = vmax.xlane.f32.xlu1 %v1075_v29 }
 0x28a   : > { %v1053_v30 = vpop.f32.mrf.mxu3 }
 0x2f3   : > { %v1080_v16 = vpop.xlane.xlu1 %1079 }
 0x2f4   : > { %v1082_v17 = vsub.f32 %v1070_v25, %v1080_v16 }
 0x2f6   : > { %v1085_v18 = vmul.f32 1.442695, %v1082_v17 }
 0x2f8   : > { %1849 = vpow2.f32 %v1085_v18 }
 0x2fb   : > { %v1077_v19 = vpop.xlane.xlu1 %1076 }
 0x2fc   : > { %v1081_v20 = vsub.f32 %v1051_v27, %v1077_v19 }
 0x2fe   : > { %v1850_v21 = vpop.eup %1849  ;;  %v1083_v22 = vmul.f32 1.442695, %v1081_v20 }
 0x2ff   : > { %v1090_v23 = vsel %vm1074_vm8, %v1850_v21, 0.0 }
 0x300   : > { %1851 = vpow2.f32 %v1083_v22  ;;  %1091 = vadd.xlane.f32.xlu2 %v1090_v23 }
 0x306   : > { %v1852_v24 = vpop.eup %1851 }
 0x307   : > { %v1087_v26 = vsel %vm1074_vm8, %v1852_v24, 0.0 }
 0x308   : > { %1088 = vadd.xlane.f32.xlu0 %v1087_v26 }
 0x373   : > { %v1092_v28 = vpop.xlane.xlu2 %1091 }
 0x374   : > { %1853 = vrcp.f32 %v1092_v28 }
 0x37a   : > { %v1854_v29 = vpop.eup %1853 }
 0x37b   : > { %v1096_v30 = vmul.f32 %v1854_v29, %v1850_v21  ;;  %v1089_v25 = vpop.xlane.xlu0 %1088  ;;  %v1235_v29 = vperm.slane %v2240_v37, 3 }
 0x37c   : > { %1855 = vrcp.f32 %v1089_v25 }
 0x37d   : > { %v1098_v31 = vpack.c.bf16 %v1096_v30, %v1096_v30 }
 0x37f   : > { %1703 = vmatmul.msk.bf16.vlgmr.msrb.gmra.mxu2 %vm1074_vm8, %v1098_v31 }
 0x382   : > { %v1856_v27 = vpop.eup %1855 }
 0x383   : > { %v1095_v32 = vmul.f32 %v1856_v27, %v1852_v24 }
 0x385   : > { %v1097_v33 = vpack.c.bf16 %v1095_v32, %v1095_v32 }
 0x387   : > { %1702 = vmatmul.msk.bf16.vlgmr.msrb.gmra.mxu1 %vm1074_vm8, %v1097_v33 }
 0x402   : > { %v1134_v35 = vpop.f32.mrf.mxu2 }
 0x403   : > { %v1139_v36 = vpack.c.bf16 %v1134_v35, %v1134_v35  ;;  %v2006_v35 = vmov 32.0  }
 0x404   : > { %v1115_v38 = vpop.f32.mrf.mxu1  ;;  %1857 = vrcp.f32 %v2006_v35 }
 0x405   : > { %v1138_v39 = vpack.c.bf16 %v1115_v38, %v1115_v38  ;;  %v1144_v40 = vshrl.u32 %v1139_v36, 16 }
 0x407   : > { %v1142_v41 = vpack.i.b16 %v1139_v36, %v1138_v39  ;;  %v1143_v42 = vshrl.u32 %v1138_v39, 16 }
 0x409   : > { %v1145_v44 = vpack.i.b16 %v1144_v40, %v1143_v42  ;;  %v1150_v45 = vperm.slane %v1142_v41, %v2249_v54  ;;  %v1769_v42 = vld [vmem:[%s2462_s23 + $0x8] sm:$0xff] }
 0x40a   : > { %v1136_v47 = vpop.f32.mrf.mxu2  ;;  %v1858_v36 = vpop.eup %1857  ;;  %1329 = vmatpush.bf16.msra.mxu0 %v1769_v42 }
 0x40b   : > { %v1151_v48 = vrot.slane %v1150_v45, 4  ;;  %v1169_v49 = vperm.slane %v1145_v44, %v2249_v54  ;;  %v1156_v50 = vperm.slane %v1150_v45, %v2251_v57  ;;  %v1268_v38 = vmul.f32 32.0, %v1858_v36 }
 0x40c   : > { %v1117_v51 = vpop.f32.mrf.mxu1  ;;  %vm1272_vm10 = vweird.f32 %v1858_v36 }
 0x40d   : > { %v1152_v52 = vsel %vm786_vm6, 0, %v1151_v48  ;;  %v1170_v53 = vrot.slane %v1169_v49, 4  ;;  %v1175_v56 = vperm.slane %v1169_v49, %v2251_v57  ;;  %v1161_v59 = vrot.slane %v1156_v50, 4 }
 0x40e   : > { %v1160_v55 = vperm.slane %v1152_v52, %v2251_v57  ;;  %v1269_v39 = vsub.f32 1.0, %v1268_v38 }
 0x40f   : > { %v1171_v58 = vsel %vm786_vm6, 0, %v1170_v53  ;;  %v1180_v63 = vrot.slane %v1175_v56, 4  ;;  %v1162_v2 = vsel %vm786_vm6, 0, %v1161_v59 }
 0x410   : > { %v1163_v60 = vrot.slane %v1160_v55, 4  ;;  %v1179_v61 = vperm.slane %v1171_v58, %v2251_v57  ;;  %v1270_v40 = vmul.f32 %v1858_v36, %v1269_v39 }
 0x411   : > { %v1181_v7 = vsel %vm786_vm6, 0, %v1180_v63  ;;  %v1297_v63 = vperm.slane %v2240_v37, 5 }
 0x412   : > { %v1164_v62 = vsel %vm786_vm6, 0, %v1163_v60  ;;  %v1182_v0 = vrot.slane %v1179_v61, 4  ;;  %v1184_v4 = vsel %vm786_vm6, %v1163_v60, %v1156_v50  ;;  %v1271_v41 = vadd.f32 %v1858_v36, %v1270_v40 }
 0x413   : > { %v1189_v1 = vrot.slane %v1164_v62, 4  ;;  %v1188_v11 = vperm.slane %v1184_v4, %v2249_v54  ;;  %v1295_v60 = vperm.slane %v2240_v37, 4  ;;  %v1772_v4 = vld [vmem:[%s2207_s21 + $0x10] sm:$0xff] }
 0x414   : > { %v1183_v3 = vsel %vm786_vm6, 0, %v1182_v0  ;;  %v1201_v9 = vsel %vm786_vm6, %v1182_v0, %v1175_v56  ;;  %v2373_v43 = vsel %vm1272_vm10, %v1858_v36, %v1271_v41 }
 0x415   : > { %v1190_v5 = vsel %vm786_vm6, %v1189_v1, %v1162_v2  ;;  %v1206_v6 = vrot.slane %v1183_v3, 4  ;;  %v1205_v14 = vperm.slane %v1201_v9, %v2249_v54  ;;  %v1773_v3 = vld [vmem:[%s2207_s21 + $0x18] sm:$0xff] }
 0x416   : > { %v1194_v8 = vperm.slane %v1190_v5, %v2249_v54  ;;  %1387 = vmatpush.bf16.msra.mxu1 %v1773_v3  ;;  %v1771_v5 = vld [vmem:[%s2207_s21 + $0x8] sm:$0xff] }
 0x417   : > { %v1207_v10 = vsel %vm786_vm6, %v1206_v6, %v1181_v7  ;;  %v1770_v6 = vld [vmem:[%s2207_s21] sm:$0xff] }
 0x418   : > { %v1195_v12 = vrot.slane %v1194_v8, 4  ;;  %v1211_v13 = vperm.slane %v1207_v10, %v2249_v54  ;;  %v1847_v7 = vld [vmem:[%s622_s29] ss:$0 sm:$0xff]  ;;  %s2465_s29 = sld [smem:[#allocation19_spill]] (!%p1739_p5) }
 0x41a   : > { %v1196_v15 = vsel %vm786_vm6, %v1195_v12, %v1188_v11  ;;  %v1212_v16 = vrot.slane %v1211_v13, 4  ;;  %1388 = vmatpush.bf16.msra.mxu1 %v1772_v4 }
 0x41b   : > { %v1200_v17 = vperm.slane %v1196_v15, %v2251_v57 }
 0x41c   : > { %v1213_v18 = vsel %vm786_vm6, %v1212_v16, %v1205_v14 }
 0x41d   : > { %v1217_v19 = vperm.slane %v1213_v18, %v2251_v57  ;;  %v1221_v20 = vshrl.u32 %v1200_v17, 16 }
 0x41e   : > { %1389 = vmatpush.bf16.msra.mxu1 %v1771_v5 }
 0x41f   : > { %v1222_v21 = vshrl.u32 %v1217_v19, 16  ;;  %v1220_v22 = vpack.i.b16 %v1217_v19, %v1200_v17 }
 0x421   : > { %v1223_v23 = vpack.i.b16 %v1222_v21, %v1221_v20  ;;  %v1354_v21 = vperm.slane %v2240_v37, 6 }
 0x422   : > { %1390 = vmatpush.bf16.msra.mxu1 %v1770_v6 }
 0x423   : > { %v1224_v24 = vunpack.c.l.b16 %v1223_v23 }
 0x425   : > { %v1225_v26 = vpack.c.b16 %v1224_v24, %v1224_v24 }
 0x427   : > { %1226 = vrot.lane.b32.xlu1 %v1225_v26, %s2005_s16 }
 0x499   : > { %v1227_v28 = vpop.permute.xlu1 %1226 }
 0x49a   : > { %v1230_v54 = vsel %vm1035_vm7, %v1220_v22, %v1227_v28 }
 0x49b   : > { %1712 = vmatmul.msk.bf16.vlgmr.msrb.gmra.mxu3 %vm693_vm5, %v1230_v54 }
 0x51e   : > { %v1259_v30 = vpop.f32.mrf.mxu3 }
 0x51f   : > { %v1260_v25 = vadd.f32 %v1259_v30, %v1235_v29 }
 0x521   : > { %v1263_v57 = vadd.f32 %v1260_v25, %v2232_v34  ;;  %v1768_v34 = vld [vmem:[%s2463_s0] sm:$0xff] }
 0x522   : > { %1330 = vmatpush.bf16.msra.mxu0 %v1768_v34  ;;  %v1421_v34 = vperm.slane %v2240_v37, 7 }
 0x523   : > { %v1264_v31 = vsel %vm693_vm5, %v1263_v57, 0.0  ;;  %v1275_v27 = vmul.f32 %v1263_v57, %v1263_v57 }
 0x524   : > { %1265 = vadd.xlane.f32.xlu1 %v1264_v31 }
 0x525   : > { %v1276_v32 = vsel %vm693_vm5, %v1275_v27, 0.0 }
 0x526   : > { %v1261_v33 = vpop.f32.mrf.mxu3  ;;  %1277 = vadd.xlane.f32.xlu2 %v1276_v32 }
 0x597   : > { %v1266_v44 = vpop.xlane.xlu1 %1265 }
 0x598   : > { %v1274_v45 = vmul.f32 %v2373_v43, %v1266_v44 }
 0x599   : > { %v1278_v46 = vpop.xlane.xlu2 %1277 }
 0x59a   : > { %v1280_v47 = vmul.f32 %v1274_v45, %v1274_v45  ;;  %v1279_v48 = vmul.f32 %v1278_v46, %v2373_v43  ;;  %v1282_v59 = vsub.f32 %v1263_v57, %v1274_v45  ;;  %v1848_v45 = vld [vmem:[%s2212_s22 + $0x8] ss:$0 sm:$0xff] }
 0x59c   : > { %v1281_v49 = vsub.f32 %v1279_v48, %v1280_v47 }
 0x59e   : > { %v1283_v50 = vadd.f32 1e-12, %v1281_v49 }
 0x5a0   : > { %1859 = vrsqrt.f32 %v1283_v50  ;;  %vm1290_vm12 = vweird.f32 %v1283_v50 }
 0x5a6   : > { %v1860_v51 = vpop.eup %1859 }
 0x5a7   : > { %v1285_v52 = vmul.f32 %v1860_v51, %v1283_v50  ;;  %vm1291_vm11 = vweird.f32 %v1860_v51 }
 0x5a8   : > { %vm1292_vm13 = vmor %vm1290_vm12, %vm1291_vm11 }
 0x5a9   : > { %v1286_v53 = vmul.f32 %v1860_v51, %v1285_v52 }
 0x5ab   : > { %v1287_v55 = vmul.f32 0.5, %v1286_v53 }
 0x5ad   : > { %v1288_v56 = vsub.f32 1.5, %v1287_v55 }
 0x5af   : > { %v1289_v58 = vmul.f32 %v1860_v51, %v1288_v56 }
 0x5b1   : > { %v1293_v61 = vsel %vm1292_vm13, %v1860_v51, %v1289_v58 }
 0x5b2   : > { %v1294_v62 = vmul.f32 %v1293_v61, %v1282_v59 }
 0x5b4   : > { %v1296_v0 = vmul.f32 %v1295_v60, %v1294_v62 }
 0x5b6   : > { %v1298_v1 = vadd.f32 %v1297_v63, %v1296_v0 }
 0x5b8   : > { %v1299_v2 = vpack.c.bf16 %v1298_v1, %v1298_v1 }
 0x5ba   : > { %1721 = vmatmul.msk.bf16.vlgmr.msra.gmra.mxu0 %vm693_vm5, %v1299_v2 }
 0x637   : > { %v1332_v8 = vpop.f32.mrf.mxu0 }
 0x638   : > { %v1333_v9 = vadd.f32 %v1847_v7, %v1332_v8 }
 0x63a   : > { %v1336_v10 = vmul.f32 %v1333_v9, %v1333_v9 }
 0x63c   : > { %v1337_v11 = vmul.f32 %v1336_v10, %v1333_v9 }
 0x63e   : > { %v1338_v12 = vmul.f32 0.044715, %v1337_v11 }
 0x63f   : > { %v1334_v13 = vpop.f32.mrf.mxu0 }
 0x640   : > { %v1339_v14 = vadd.f32 %v1338_v12, %v1333_v9 }
 0x642   : > { %v1340_v15 = vmul.f32 0.7978846, %v1339_v14 }
 0x644   : > { %1861 = vtanh.f32 %v1340_v15 }
 0x64a   : > { %v1862_v16 = vpop.eup %1861 }
 0x64b   : > { %v1342_v17 = vadd.f32 1.0, %v1862_v16 }
 0x64d   : > { %v1343_v18 = vmul.f32 0.5, %v1342_v17 }
 0x64f   : > { %v1344_v19 = vmul.f32 %v1343_v18, %v1333_v9 }
 0x651   : > { %v1345_v20 = vpack.c.bf16 %v1344_v19, %v1344_v19 }
 0x653   : > { %1738 = vmatmul.msk.bf16.vlgmr.msra.gmra.mxu1 %vm1379_vm14, %v1345_v20 }
 0x6d0   : > { %v1392_v22 = vpop.f32.mrf.mxu1 }
 0x6d1   : > { %v1393_v23 = vadd.f32 %v1392_v22, %v1354_v21 }
 0x6d3   : > { %v1396_v24 = vadd.f32 %v1393_v23, %v1298_v1 }
 0x6d5   : > { %v1397_v26 = vsel %vm693_vm5, %v1396_v24, 0.0  ;;  %v1401_v28 = vmul.f32 %v1396_v24, %v1396_v24 }
 0x6d6   : > { %1398 = vadd.xlane.f32.xlu2 %v1397_v26 }
 0x6d7   : > { %v1402_v54 = vsel %vm693_vm5, %v1401_v28, 0.0 }
 0x6d8   : > { %v1394_v29 = vpop.f32.mrf.mxu1  ;;  %1403 = vadd.xlane.f32.xlu0 %v1402_v54 }
 0x749   : > { %v1399_v30 = vpop.xlane.xlu2 %1398 }
 0x74a   : > { %v1400_v25 = vmul.f32 %v1399_v30, %v2373_v43 }
 0x74b   : > { %v1404_v57 = vpop.xlane.xlu0 %1403 }
 0x74c   : > { %v1406_v31 = vmul.f32 %v1400_v25, %v1400_v25  ;;  %v1405_v27 = vmul.f32 %v1404_v57, %v2373_v43  ;;  %v1408_v42 = vsub.f32 %v1396_v24, %v1400_v25 }
 0x74e   : > { %v1407_v32 = vsub.f32 %v1405_v27, %v1406_v31 }
 0x750   : > { %v1409_v33 = vadd.f32 1e-12, %v1407_v32 }
 0x752   : > { %1863 = vrsqrt.f32 %v1409_v33  ;;  %vm1416_vm0 = vweird.f32 %v1409_v33 }
 0x758   : > { %v1864_v35 = vpop.eup %1863 }
 0x759   : > { %v1411_v36 = vmul.f32 %v1864_v35, %v1409_v33  ;;  %vm1417_vm15 = vweird.f32 %v1864_v35 }
 0x75a   : > { %vm1418_vm1 = vmor %vm1416_vm0, %vm1417_vm15 }
 0x75b   : > { %v1412_v38 = vmul.f32 %v1864_v35, %v1411_v36 }
 0x75d   : > { %v1413_v39 = vmul.f32 0.5, %v1412_v38 }
 0x75f   : > { %v1414_v40 = vsub.f32 1.5, %v1413_v39 }
 0x761   : > { %v1415_v41 = vmul.f32 %v1864_v35, %v1414_v40 }
 0x763   : > { %v1419_v44 = vsel %vm1418_vm1, %v1864_v35, %v1415_v41 }
 0x764   : > { %v1420_v46 = vmul.f32 %v1419_v44, %v1408_v42 }
 0x766   : > { %v1422_v43 = vmul.f32 %v1421_v34, %v1420_v46  ;;  %1429 = sbr.rel (%p1739_p5) target bundleno = 2398 (0x95e), region = 88 }
 0x768   : > { %v1424_v47 = vadd.f32 %v1848_v45, %v1422_v43 }
 0x76a   : > { %1425 = vst.msk [vmem:[#allocation7] sm:$0xff] %vm693_vm5, %v1424_v47 }
 0x76b   : > { %v1775_v48 = vld [vmem:[%s2439_s11 + $0x8] sm:$0xff]  ;;  %v1774_v37 = vld [vmem:[%s2439_s11] sm:$0xff]  ;;  %v1430_v49 = vpack.c.bf16 %v1424_v47, %v1424_v47  ;;  %vm1467_vm2 = vcmask 31744   ;;  %v1471_v56 = vlaneseq }
 0x76c   : > { %1460 = vmatpush.bf16.msra.mxu0 %v1775_v48  ;;  %v1865_v50 = vld [vmem:[%s2464_s24] ss:$0 sm:$0xff] }
 0x76d   : > { %v1472_v58 = vand.u32 127, %v1471_v56 }
 0x770   : > { %1461 = vmatpush.bf16.msra.mxu0 %v1774_v37 }
 0x773   : > { %1748 = vmatmul.msk.bf16.vlgmr.msra.gmra.mxu0 %vm693_vm5, %v1430_v49  ;;  %vm1490_vm5 = vcmask 7168  }
 0x7f0   : > { %v1463_v51 = vpop.f32.mrf.mxu0 }
 0x7f1   : > { %v1464_v52 = vadd.f32 %v1865_v50, %v1463_v51 }
 0x7f3   : > { %v1468_v53 = vsel %vm1467_vm2, %v1464_v52, -inf }
 0x7f4   : > { %1469 = vmax.xlane.f32.xlu0 %v1468_v53 }
 0x7f8   : > { %v1465_v55 = vpop.f32.mrf.mxu0 }
 0x867   : > { %v1470_v59 = vpop.xlane.xlu0 %1469 }
 0x868   : > { %vm1473_vm3 = vcmp.eq.f32.partialorder %v1464_v52, %v1470_v59 }
 0x869   : > { %v1474_v60 = vsel %vm1473_vm3, %v1472_v58, 4 }
 0x86a   : > { %v1475_v61 = vsel %vm1467_vm2, %v1474_v60, 2147483647 }
 0x86b   : > { %v1477_v62 = vshra.s32 %v1475_v61, 16  ;;  %v1476_v0 = vand.u32 65535, %v1475_v61 }
 0x86d   : > { %v1479_v63 = vcvt.s32.f32 %v1477_v62  ;;  %v1478_v2 = vcvt.s32.f32 %v1476_v0 }
 0x86f   : > { %1480 = vmin.xlane.f32.xlu0 %v1479_v63 }
 0x8e2   : > { %v1481_v1 = vpop.xlane.xlu0 %1480 }
 0x8e3   : > { %vm1482_vm4 = vcmp.eq.f32.partialorder %v1479_v63, %v1481_v1  ;;  %v1487_v4 = vcvt.f32.s32 %v1481_v1 }
 0x8e4   : > { %v1483_v3 = vsel %vm1482_vm4, %v1478_v2, inf }
 0x8e5   : > { %1484 = vmin.xlane.f32.xlu1 %v1483_v3  ;;  %v1488_v6 = vshll.u32 %v1487_v4, 16 }
 0x958   : > { %v1485_v5 = vpop.xlane.xlu1 %1484 }
 0x959   : > { %v1486_v7 = vcvt.f32.s32 %v1485_v5 }
 0x95b   : > { %v1489_v8 = vadd.s32 %v1488_v6, %v1486_v7 }
 0x95d   : > { %1491 = vst.msk [vmem:[%s2465_s29] sm:$0xff] %vm1490_vm5, %v1489_v8 }
 0x95e PF: > { %p1797_p8 = scmp.eq.s32.totalorder %s2102_s17, 1  ;;  %s2007_s3 = smov [#allocation7]  }
 0x95f   : > { %s1498_s4 = sshll.u32 %s2007_s3, 4  ;;  %s2466_s14 = sld [smem:[#allocation18_spill]]  ;;  %s1499_s4 = int_to_ptr.vmem [resolvable:$true] %s1498_s4 }
 0x965   : > { %s1500_s16 = sshll.u32 %s2466_s14, 4  ;;  %s1501_s16 = int_to_ptr.hbm [resolvable:$true] %s1500_s16 }
 0x966   : > { %1783 = dma.vmem_to_hbm [thread:$0]  (%p1797_p8), %s1499_s4, 128, %s1501_s16, [#allocation4]  }
 0x967   : > { %1979 = dma.done.wait (%p1797_p8), [#allocation4], 128  }
 0x968   : > { %1981 = vsyncadd (%p1797_p8), [#allocation4], 4294967168 }
 0x969 PF: > { %s2467_s16 = sld [smem:[#allocation12_spill]]  ;;  %s2470_s29 = smov %s1988_s30 }
 0x96a   : > { %s2468_s23 = sld [smem:[#allocation11_spill]] }
 0x96b   : > { %s2469_s15 = sld [smem:[#allocation13_spill]] }
 0x96f   : > { %p27_p9 = scmp.ge.s32.totalorder %s2467_s16, 4  }
 0x970   : > { %s2471_s30 = smov %s2468_s23 }
 0x971   :  { %29 = sbr.rel (!%p27_p9) target bundleno = 12 (0xc), region = 151 }
 0x976   :  { %1520 = vsyncpa [#allocation3], 1 }
 0x977   :  { %1522 = vsyncpa [#allocation3 + $0x1], 1 }
 0x978   :  { %1523 = vsyncpa [#allocation6], 1 }
 0x979   :  { %1525 = vsyncpa [#allocation6 + $0x1], 1 }
 0x97a   :  { %1526 = vsyncpa [#allocation4], 1 }
 0x97b   :  { %1528 = vsyncpa [#allocation4 + $0x1], 1 }

</bundles_post_ra>
